<compile_context>
chip_gen: v6e
topology: v6e:2x2x1
jax: 0.10.0
libtpu: 0.0.40
codegen_flags: <defaults>
</compile_context>

<pallas_src>
import numpy as np
import jax
import jax.numpy as jnp
from jax.experimental import pallas as pl
from jax.experimental.pallas import tpu as pltpu

N_LAYERS = 2
IN_DIM = 8
HIDDEN_DIM = 8
OUT_DIM = 4
N_HEADS = 4
HC = N_HEADS * HIDDEN_DIM                 # 32
GATE_COL = HC + 2 * N_HEADS               # 40: column of wg in the aug matmul
POOLING_LIST = ("att", "mean", "max")     # order matches pooling_weights
NEG = -1e30

# packed weight slab layout (rows x 48 f32, all segments 8-row aligned)
SLAB_COLS = 48
SLAB_ROWS = 160
# rows   0:8    W_aug0 = [W0 | W0@A0 | wg0]          (8  x 41)
# rows   8:40   W_aug1 = [W1 | W1@A1 | wg1]          (32 x 41)
# rows  40:72   wg2                                   (32 x 1)
# row   72      cb0 (conv0 bias)                      (1  x 32)
# row   80      cb1 (conv1 bias)                      (1  x 32)
# rows  88:96   v0 = hw0 * (wl0 @ beta)               (8  x 1)
# rows  96:128  v1 = hw1 * (wl1 @ beta)               (32 x 1)
# rows 128:160  v2 = hw2 * (wl2 @ beta)               (32 x 1)
# TODO(synk): 'min'/'skewness'/'kurtosis' poolings (host-side scipy in the
#             original) are not part of this pooling_list and are not fused.


# --------------------------------------------------------------------------
# Fused forward kernel
# --------------------------------------------------------------------------
def _fused_kernel(scal, x_ref, adj_ref, memb_ref, w_ref, o_ref):
    # --- scalar constants from SMEM ----------------------------------------
    pw_att, pw_mean, pw_max = scal[0], scal[1], scal[2]     # pooling weights
    bg0, bg1, bg2 = scal[3], scal[4], scal[5]               # gate biases
    c_const = scal[6]                                       # folded bias + h0

    x = x_ref[...]                     # [N, IN_DIM]
    adj = adj_ref[...]                 # [N, N]
    memb_scaled = memb_ref[...]        # [B, N], rows pre-scaled by 1/count
    w = w_ref[...]                     # [160, 48] packed weight slab
    n_graphs = memb_scaled.shape[0]

    # additive masks hoisted once (reused by every layer / head)
    adj_neg = jnp.where(adj > 0.0, 0.0, NEG)                # [N, N]
    memb_neg = jnp.where(memb_scaled > 0.0, 0.0, NEG)       # [B, N]
    memb_neg_t = memb_neg.T                                 # [N, B]

    # --- pooling ('att'/'mean'/'max') + folded prediction -> [B,1] ----------
    def pool_risk(xv, gate_z, v_vec):
        gate = 1.0 / (1.0 + jnp.exp(-gate_z))                        # sigmoid [N,1]
        logits = gate.T + memb_neg                                   # [B,N]
        mx = jnp.max(logits, axis=-1, keepdims=True)
        p = jnp.exp(logits - mx)                  # masked entries underflow to 0
        attn = p / jnp.sum(p, axis=-1, keepdims=True)                # exact divide
        # att-pool and mean-pool share one MXU matmul
        lhs = jnp.concatenate([attn, memb_scaled], axis=0)           # [2B,N]
        pooled = jnp.dot(lhs, xv, preferred_element_type=jnp.float32)  # [2B,F]
        pooled_att = pooled[:n_graphs, :]
        pooled_mean = pooled[n_graphs:, :]
        # global_max_pool (B small & static)
        rows = []
        for b in range(n_graphs):
            rows.append(jnp.max(xv + memb_neg_t[:, b:b + 1], axis=0, keepdims=True))
        pooled_max = jnp.concatenate(rows, axis=0)                   # [B,F]
        weighted = pw_att * pooled_att + pw_mean * pooled_mean + pw_max * pooled_max
        # prediction Linear, h_weight and beta already folded into v_vec
        return jnp.dot(weighted, v_vec, preferred_element_type=jnp.float32)  # [B,1]

    # --- GATConv aggregation from the augmented projection ------------------
    # y = xv @ [W | W@A | wg] : cols 0:HC = Wx, HC:HC+H = a_src, HC+H:HC+2H = a_dst
    def gat_conv(y, cbias, apply_relu):
        xw = y[:, :HC]                                               # [N,HC]
        a_src_t = y[:, HC:HC + N_HEADS].T                            # [H,N] one transpose
        a_dst = y[:, HC + N_HEADS:HC + 2 * N_HEADS]                  # [N,H]
        head_outs = []
        for h in range(N_HEADS):                                     # H small & static
            e = a_dst[:, h:h + 1] + a_src_t[h:h + 1, :]              # e[i,j]=a_d[i]+a_s[j]
            e = jnp.where(e >= 0.0, e, 0.2 * e)                      # LeakyReLU(0.2)
            e = e + adj_neg                                          # mask non-edges
            m = jnp.max(e, axis=-1, keepdims=True)
            p = jnp.exp(e - m)                # masked -> 0 (self loops keep m finite)
            alpha = p / jnp.sum(p, axis=-1, keepdims=True)           # exact divide
            # TODO(synk): attn_drop dropout is identity in eval mode (deterministic).
            head_outs.append(jnp.dot(alpha, xw[:, h * HIDDEN_DIM:(h + 1) * HIDDEN_DIM],
                                     preferred_element_type=jnp.float32))
        out = jnp.concatenate(head_outs, axis=-1) + cbias            # [N,HC]
        if apply_relu:
            out = jnp.maximum(out, 0.0)
        return out

    # --- layer schedule (matches the PyTorch forward) ------------------------
    # TODO(synk): feat_drop dropout is identity in eval mode (deterministic run).

    # layer 0: fused projection (conv0 + gate0), pooling on x, then conv0
    y0 = jnp.dot(x, w[0:IN_DIM, :], preferred_element_type=jnp.float32)       # [N,48]
    gate_z0 = y0[:, GATE_COL:GATE_COL + 1] + bg0
    r0 = pool_risk(x, gate_z0, w[88:88 + IN_DIM, 0:1])
    x1 = gat_conv(y0, w[72:73, 0:HC], apply_relu=True)

    # layer 1: fused projection (conv1 + gate1), pooling on x1, then conv1
    y1 = jnp.dot(x1, w[8:8 + HC, :], preferred_element_type=jnp.float32)      # [N,48]
    gate_z1 = y1[:, GATE_COL:GATE_COL + 1] + bg1
    r1 = pool_risk(x1, gate_z1, w[96:96 + HC, 0:1])
    x2 = gat_conv(y1, w[80:81, 0:HC], apply_relu=False)

    # layer 2: final pooling on x2 (gate2 is the only standalone gate matmul)
    gate_z2 = jnp.dot(x2, w[40:40 + HC, 0:1],
                      preferred_element_type=jnp.float32) + bg2
    r2 = pool_risk(x2, gate_z2, w[128:128 + HC, 0:1])

    o_ref[...] = r0 + r1 + r2 + c_const                                       # [B,1]


# --------------------------------------------------------------------------
# Host-side packing helpers (NumPy; no traced scatter prologue)
# --------------------------------------------------------------------------
def _build_att_matrix_np(att_src, att_dst):
    """Block-diagonal [H*C, 2H]: (xw @ A)[:, :H]=a_src, [:, H:]=a_dst per head."""
    H, C = att_src.shape
    a = np.zeros((H * C, 2 * H), np.float32)
    for h in range(H):
        a[h * C:(h + 1) * C, h] = att_src[h]
        a[h * C:(h + 1) * C, H + h] = att_dst[h]
    return a


def pack_params(params):
    (w0, asrc0, adst0, cb0) = params["convs"][0]
    (w1, asrc1, adst1, cb1) = params["convs"][1]
    (wg0, bg0), (wg1, bg1), (wg2, bg2) = params["gates"]
    (wl0, bl0), (wl1, bl1), (wl2, bl2) = params["lins"]

    pw = np.asarray(params["pool_w"], np.float32).reshape(-1)
    hw = np.asarray(params["h_weights"], np.float32).reshape(-1)
    h0 = np.asarray(params["h0"], np.float32).item()
    beta = np.asarray(params["beta"], np.float32).reshape(OUT_DIM, 1)

    w0n, w1n = np.asarray(w0, np.float32), np.asarray(w1, np.float32)
    a0 = _build_att_matrix_np(np.asarray(asrc0, np.float32), np.asarray(adst0, np.float32))
    a1 = _build_att_matrix_np(np.asarray(asrc1, np.float32), np.asarray(adst1, np.float32))

    w_aug0 = np.concatenate([w0n, w0n @ a0, np.asarray(wg0, np.float32)], axis=1)  # [8,41]
    w_aug1 = np.concatenate([w1n, w1n @ a1, np.asarray(wg1, np.float32)], axis=1)  # [32,41]

    v0 = hw[0] * (np.asarray(wl0, np.float32) @ beta)        # [8,1]
    v1 = hw[1] * (np.asarray(wl1, np.float32) @ beta)        # [32,1]
    v2 = hw[2] * (np.asarray(wl2, np.float32) @ beta)        # [32,1]
    c = (hw[0] * (np.asarray(bl0, np.float32) @ beta)
         + hw[1] * (np.asarray(bl1, np.float32) @ beta)
         + hw[2] * (np.asarray(bl2, np.float32) @ beta)).item() + h0

    slab = np.zeros((SLAB_ROWS, SLAB_COLS), np.float32)
    slab[0:IN_DIM, 0:w_aug0.shape[1]] = w_aug0
    slab[8:8 + HC, 0:w_aug1.shape[1]] = w_aug1
    slab[40:40 + HC, 0:1] = np.asarray(wg2, np.float32)
    slab[72, 0:HC] = np.asarray(cb0, np.float32).reshape(-1)
    slab[80, 0:HC] = np.asarray(cb1, np.float32).reshape(-1)
    slab[88:88 + IN_DIM, 0:1] = v0
    slab[96:96 + HC, 0:1] = v1
    slab[128:128 + HC, 0:1] = v2

    scal = np.array([pw[0], pw[1], pw[2],
                     np.asarray(bg0, np.float32).item(),
                     np.asarray(bg1, np.float32).item(),
                     np.asarray(bg2, np.float32).item(),
                     c], np.float32)
    return jnp.asarray(slab), jnp.asarray(scal)


def gat_stat_forward(x, adj, memb, params):
    B = memb.shape[0]
    wslab, scal = pack_params(params)

    # mean-pool rows pre-scaled by 1/|graph| (mask recovered from >0 in-kernel)
    counts = jnp.sum(memb, axis=1, keepdims=True)
    memb_scaled = (memb / counts).astype(jnp.float32)

    vm = pl.BlockSpec(memory_space=pltpu.MemorySpace.VMEM)
    sm = pl.BlockSpec(memory_space=pltpu.MemorySpace.SMEM)

    risk = pl.pallas_call(
        _fused_kernel,
        out_shape=jax.ShapeDtypeStruct((B, 1), jnp.float32),
        in_specs=[sm, vm, vm, vm, vm],
        out_specs=vm,
    )(scal, x, adj, memb_scaled, wslab)
    return risk[:, 0]


# --------------------------------------------------------------------------
# Parameters (deterministic synthetic init)
# --------------------------------------------------------------------------
def init_params(key):
    convs, gates, lins = [], [], []
    for l in range(N_LAYERS):
        fin = IN_DIM if l == 0 else HC
        key, k1, k2, k3, k4 = jax.random.split(key, 5)
        convs.append((
            jax.random.normal(k1, (fin, HC), jnp.float32) * 0.1,                # W
            jax.random.normal(k2, (N_HEADS, HIDDEN_DIM), jnp.float32) * 0.1,    # att_src
            jax.random.normal(k3, (N_HEADS, HIDDEN_DIM), jnp.float32) * 0.1,    # att_dst
            jax.random.normal(k4, (1, HC), jnp.float32) * 0.1,                  # bias
        ))
    for l in range(N_LAYERS + 1):
        fin = IN_DIM if l == 0 else HC
        key, k1, k2, k3, k4 = jax.random.split(key, 5)
        gates.append((jax.random.normal(k1, (fin, 1), jnp.float32) * 0.1,
                      jax.random.normal(k2, (1, 1), jnp.float32) * 0.1))
        lins.append((jax.random.normal(k3, (fin, OUT_DIM), jnp.float32) * 0.1,
                     jax.random.normal(k4, (1, OUT_DIM), jnp.float32) * 0.1))
    key, k1, k2 = jax.random.split(key, 3)
    return dict(
        convs=convs, gates=gates, lins=lins,
        pool_w=jnp.full((1, len(POOLING_LIST)), 1.0 / len(POOLING_LIST), jnp.float32),
        h_weights=jnp.full((N_LAYERS + 1,), 1.0 / (N_LAYERS + 1), jnp.float32),
        h0=jax.random.normal(k1, (1,), jnp.float32),
        beta=jax.random.normal(k2, (OUT_DIM,), jnp.float32),
    )


if __name__ == "__main__":
    key = jax.random.PRNGKey(0)
    key, kx = jax.random.split(key)

    N, B = 16, 2
    per = N // B
    x = jax.random.normal(kx, (N, IN_DIM), jnp.float32)

    # synthetic batched graph: two 8-node bidirectional rings + self loops
    adj_np = np.eye(N, dtype=np.float32)
    for g in range(B):
        base = g * per
        for k in range(per):
            s = base + k
            d = base + (k + 1) % per
            adj_np[d, s] = 1.0
            adj_np[s, d] = 1.0
    adj = jnp.asarray(adj_np)

    batch = np.repeat(np.arange(B), per)
    memb_np = np.zeros((B, N), np.float32)
    memb_np[batch, np.arange(N)] = 1.0
    memb = jnp.asarray(memb_np)

    params = init_params(key)
    risk = gat_stat_forward(x, adj, memb, params)
    jax.block_until_ready(risk)
    assert risk.shape == (B,)
    print("KERNEL_OK")
</pallas_src>

<mosaic_0001>
module attributes {stable_mosaic.version = 11 : i64} {
  func.func @_fused_kernel(%arg0: memref<7xf32, #tpu.memory_space<smem>>, %arg1: memref<16x8xf32, #tpu.memory_space<vmem>>, %arg2: memref<16x16xf32, #tpu.memory_space<vmem>>, %arg3: memref<2x16xf32, #tpu.memory_space<vmem>>, %arg4: memref<160x48xf32, #tpu.memory_space<vmem>>, %arg5: memref<2x1xf32, #tpu.memory_space<vmem>>) attributes {dimension_semantics = [], scalar_prefetch = 0 : i64, scratch_operands = 0 : i64, tpu.core_type = #tpu.core_type<tc>} {
    %c0 = arith.constant 0 : index
    %0 = memref.load %arg0[%c0] : memref<7xf32, #tpu.memory_space<smem>>
    %c1 = arith.constant 1 : index
    %1 = memref.load %arg0[%c1] : memref<7xf32, #tpu.memory_space<smem>>
    %c2 = arith.constant 2 : index
    %2 = memref.load %arg0[%c2] : memref<7xf32, #tpu.memory_space<smem>>
    %c3 = arith.constant 3 : index
    %3 = memref.load %arg0[%c3] : memref<7xf32, #tpu.memory_space<smem>>
    %c4 = arith.constant 4 : index
    %4 = memref.load %arg0[%c4] : memref<7xf32, #tpu.memory_space<smem>>
    %c5 = arith.constant 5 : index
    %5 = memref.load %arg0[%c5] : memref<7xf32, #tpu.memory_space<smem>>
    %c6 = arith.constant 6 : index
    %6 = memref.load %arg0[%c6] : memref<7xf32, #tpu.memory_space<smem>>
    %c0_0 = arith.constant 0 : index
    %c0_1 = arith.constant 0 : index
    %7 = vector.load %arg1[%c0_0, %c0_1] : memref<16x8xf32, #tpu.memory_space<vmem>>, vector<16x8xf32>
    %c0_2 = arith.constant 0 : index
    %c0_3 = arith.constant 0 : index
    %8 = vector.load %arg2[%c0_2, %c0_3] : memref<16x16xf32, #tpu.memory_space<vmem>>, vector<16x16xf32>
    %c0_4 = arith.constant 0 : index
    %c0_5 = arith.constant 0 : index
    %9 = vector.load %arg3[%c0_4, %c0_5] : memref<2x16xf32, #tpu.memory_space<vmem>>, vector<2x16xf32>
    %c0_6 = arith.constant 0 : index
    %c0_7 = arith.constant 0 : index
    %10 = vector.load %arg4[%c0_6, %c0_7] : memref<160x48xf32, #tpu.memory_space<vmem>>, vector<160x48xf32>
    %cst = arith.constant 0.000000e+00 : f32
    %11 = vector.broadcast %cst : f32 to vector<16x16xf32>
    %12 = arith.cmpf ogt, %8, %11 : vector<16x16xf32>
    %cst_8 = arith.constant 0.000000e+00 : f32
    %cst_9 = arith.constant -1.000000e+30 : f32
    %13 = vector.broadcast %cst_8 : f32 to vector<16x16xf32>
    %14 = vector.broadcast %cst_9 : f32 to vector<16x16xf32>
    %15 = arith.select %12, %13, %14 : vector<16x16xi1>, vector<16x16xf32>
    %cst_10 = arith.constant 0.000000e+00 : f32
    %16 = vector.broadcast %cst_10 : f32 to vector<2x16xf32>
    %17 = arith.cmpf ogt, %9, %16 : vector<2x16xf32>
    %cst_11 = arith.constant 0.000000e+00 : f32
    %cst_12 = arith.constant -1.000000e+30 : f32
    %18 = vector.broadcast %cst_11 : f32 to vector<2x16xf32>
    %19 = vector.broadcast %cst_12 : f32 to vector<2x16xf32>
    %20 = arith.select %17, %18, %19 : vector<2x16xi1>, vector<2x16xf32>
    %21 = tpu.transpose %20, [1, 0] : vector<2x16xf32> -> vector<16x2xf32>
    %22 = vector.extract_strided_slice %10 {offsets = [0, 0], sizes = [8, 48], strides = [1, 1]} : vector<160x48xf32> to vector<8x48xf32>
    %cst_13 = arith.constant dense<0.000000e+00> : vector<16x48xf32>
    %23 = tpu.matmul %7, %22, %cst_13 {dimension_numbers = #tpu.dot_dimension_numbers<[1], [0], [0], [1], [0, 0, 1, 1], [], []>} : vector<16x8xf32>, vector<8x48xf32>, vector<16x48xf32> -> vector<16x48xf32>
    %24 = vector.extract_strided_slice %23 {offsets = [0, 40], sizes = [16, 1], strides = [1, 1]} : vector<16x48xf32> to vector<16x1xf32>
    %25 = vector.broadcast %3 : f32 to vector<16x1xf32>
    %26 = arith.addf %24, %25 : vector<16x1xf32>
    %27 = vector.extract_strided_slice %10 {offsets = [88, 0], sizes = [8, 1], strides = [1, 1]} : vector<160x48xf32> to vector<8x1xf32>
    %cst_14 = arith.constant 0.000000e+00 : f32
    %28 = vector.broadcast %cst_14 : f32 to vector<16x1xf32>
    %29 = arith.subf %28, %26 : vector<16x1xf32>
    %30 = math.exp %29 : vector<16x1xf32>
    %cst_15 = arith.constant 1.000000e+00 : f32
    %31 = vector.broadcast %cst_15 : f32 to vector<16x1xf32>
    %32 = arith.addf %31, %30 : vector<16x1xf32>
    %cst_16 = arith.constant 1.000000e+00 : f32
    %33 = vector.broadcast %cst_16 : f32 to vector<16x1xf32>
    %34 = arith.divf %33, %32 : vector<16x1xf32>
    %35 = tpu.transpose %34, [1, 0] : vector<16x1xf32> -> vector<1x16xf32>
    %36 = vector.broadcast %35 : vector<1x16xf32> to vector<2x16xf32>
    %37 = arith.addf %36, %20 : vector<2x16xf32>
    %cst_17 = arith.constant dense<0xFF800000> : vector<2xf32>
    %38 = vector.multi_reduction <maximumf>, %37, %cst_17 [1] : vector<2x16xf32> to vector<2xf32>
    %39 = vector.shape_cast %38 : vector<2xf32> to vector<2x1xf32>
    %40 = vector.broadcast %39 : vector<2x1xf32> to vector<2x16xf32>
    %41 = arith.subf %37, %40 : vector<2x16xf32>
    %42 = math.exp %41 : vector<2x16xf32>
    %cst_18 = arith.constant dense<0.000000e+00> : vector<2xf32>
    %43 = vector.multi_reduction <add>, %42, %cst_18 [1] : vector<2x16xf32> to vector<2xf32>
    %44 = vector.shape_cast %43 : vector<2xf32> to vector<2x1xf32>
    %45 = vector.broadcast %44 : vector<2x1xf32> to vector<2x16xf32>
    %46 = arith.divf %42, %45 : vector<2x16xf32>
    %47 = tpu.concatenate %46, %9 in 0 : vector<2x16xf32>, vector<2x16xf32> -> vector<4x16xf32>
    %cst_19 = arith.constant dense<0.000000e+00> : vector<4x8xf32>
    %48 = tpu.matmul %47, %7, %cst_19 {dimension_numbers = #tpu.dot_dimension_numbers<[1], [0], [0], [1], [0, 0, 1, 1], [], []>} : vector<4x16xf32>, vector<16x8xf32>, vector<4x8xf32> -> vector<4x8xf32>
    %49 = vector.extract_strided_slice %48 {offsets = [0, 0], sizes = [2, 8], strides = [1, 1]} : vector<4x8xf32> to vector<2x8xf32>
    %50 = vector.extract_strided_slice %48 {offsets = [2, 0], sizes = [2, 8], strides = [1, 1]} : vector<4x8xf32> to vector<2x8xf32>
    %51 = vector.extract_strided_slice %21 {offsets = [0, 0], sizes = [16, 1], strides = [1, 1]} : vector<16x2xf32> to vector<16x1xf32>
    %52 = vector.broadcast %51 : vector<16x1xf32> to vector<16x8xf32>
    %53 = arith.addf %7, %52 : vector<16x8xf32>
    %cst_20 = arith.constant dense<0xFF800000> : vector<8xf32>
    %54 = vector.multi_reduction <maximumf>, %53, %cst_20 [0] : vector<16x8xf32> to vector<8xf32>
    %55 = vector.shape_cast %54 : vector<8xf32> to vector<1x8xf32>
    %56 = vector.extract_strided_slice %21 {offsets = [0, 1], sizes = [16, 1], strides = [1, 1]} : vector<16x2xf32> to vector<16x1xf32>
    %57 = vector.broadcast %56 : vector<16x1xf32> to vector<16x8xf32>
    %58 = arith.addf %7, %57 : vector<16x8xf32>
    %cst_21 = arith.constant dense<0xFF800000> : vector<8xf32>
    %59 = vector.multi_reduction <maximumf>, %58, %cst_21 [0] : vector<16x8xf32> to vector<8xf32>
    %60 = vector.shape_cast %59 : vector<8xf32> to vector<1x8xf32>
    %61 = tpu.concatenate %55, %60 in 0 : vector<1x8xf32>, vector<1x8xf32> -> vector<2x8xf32>
    %62 = vector.broadcast %0 : f32 to vector<2x8xf32>
    %63 = arith.mulf %62, %49 : vector<2x8xf32>
    %64 = vector.broadcast %1 : f32 to vector<2x8xf32>
    %65 = arith.mulf %64, %50 : vector<2x8xf32>
    %66 = arith.addf %63, %65 : vector<2x8xf32>
    %67 = vector.broadcast %2 : f32 to vector<2x8xf32>
    %68 = arith.mulf %67, %61 : vector<2x8xf32>
    %69 = arith.addf %66, %68 : vector<2x8xf32>
    %cst_22 = arith.constant dense<0.000000e+00> : vector<2x1xf32>
    %70 = tpu.matmul %69, %27, %cst_22 {dimension_numbers = #tpu.dot_dimension_numbers<[1], [0], [0], [1], [0, 0, 1, 1], [], []>} : vector<2x8xf32>, vector<8x1xf32>, vector<2x1xf32> -> vector<2x1xf32>
    %71 = vector.extract_strided_slice %10 {offsets = [72, 0], sizes = [1, 32], strides = [1, 1]} : vector<160x48xf32> to vector<1x32xf32>
    %72 = vector.extract_strided_slice %23 {offsets = [0, 0], sizes = [16, 32], strides = [1, 1]} : vector<16x48xf32> to vector<16x32xf32>
    %73 = vector.extract_strided_slice %23 {offsets = [0, 32], sizes = [16, 4], strides = [1, 1]} : vector<16x48xf32> to vector<16x4xf32>
    %74 = tpu.transpose %73, [1, 0] : vector<16x4xf32> -> vector<4x16xf32>
    %75 = vector.extract_strided_slice %23 {offsets = [0, 36], sizes = [16, 4], strides = [1, 1]} : vector<16x48xf32> to vector<16x4xf32>
    %76 = vector.extract_strided_slice %75 {offsets = [0, 0], sizes = [16, 1], strides = [1, 1]} : vector<16x4xf32> to vector<16x1xf32>
    %77 = vector.extract_strided_slice %74 {offsets = [0, 0], sizes = [1, 16], strides = [1, 1]} : vector<4x16xf32> to vector<1x16xf32>
    %78 = vector.broadcast %76 : vector<16x1xf32> to vector<16x16xf32>
    %79 = vector.broadcast %77 : vector<1x16xf32> to vector<16x16xf32>
    %80 = arith.addf %78, %79 : vector<16x16xf32>
    %cst_23 = arith.constant 0.000000e+00 : f32
    %81 = vector.broadcast %cst_23 : f32 to vector<16x16xf32>
    %82 = arith.cmpf oge, %80, %81 : vector<16x16xf32>
    %cst_24 = arith.constant 2.000000e-01 : f32
    %83 = vector.broadcast %cst_24 : f32 to vector<16x16xf32>
    %84 = arith.mulf %83, %80 : vector<16x16xf32>
    %85 = arith.select %82, %80, %84 : vector<16x16xi1>, vector<16x16xf32>
    %86 = arith.addf %85, %15 : vector<16x16xf32>
    %cst_25 = arith.constant dense<0xFF800000> : vector<16xf32>
    %87 = vector.multi_reduction <maximumf>, %86, %cst_25 [1] : vector<16x16xf32> to vector<16xf32>
    %88 = vector.shape_cast %87 : vector<16xf32> to vector<16x1xf32>
    %89 = vector.broadcast %88 : vector<16x1xf32> to vector<16x16xf32>
    %90 = arith.subf %86, %89 : vector<16x16xf32>
    %91 = math.exp %90 : vector<16x16xf32>
    %cst_26 = arith.constant dense<0.000000e+00> : vector<16xf32>
    %92 = vector.multi_reduction <add>, %91, %cst_26 [1] : vector<16x16xf32> to vector<16xf32>
    %93 = vector.shape_cast %92 : vector<16xf32> to vector<16x1xf32>
    %94 = vector.broadcast %93 : vector<16x1xf32> to vector<16x16xf32>
    %95 = arith.divf %91, %94 : vector<16x16xf32>
    %96 = vector.extract_strided_slice %72 {offsets = [0, 0], sizes = [16, 8], strides = [1, 1]} : vector<16x32xf32> to vector<16x8xf32>
    %cst_27 = arith.constant dense<0.000000e+00> : vector<16x8xf32>
    %97 = tpu.matmul %95, %96, %cst_27 {dimension_numbers = #tpu.dot_dimension_numbers<[1], [0], [0], [1], [0, 0, 1, 1], [], []>} : vector<16x16xf32>, vector<16x8xf32>, vector<16x8xf32> -> vector<16x8xf32>
    %98 = vector.extract_strided_slice %75 {offsets = [0, 1], sizes = [16, 1], strides = [1, 1]} : vector<16x4xf32> to vector<16x1xf32>
    %99 = vector.extract_strided_slice %74 {offsets = [1, 0], sizes = [1, 16], strides = [1, 1]} : vector<4x16xf32> to vector<1x16xf32>
    %100 = vector.broadcast %98 : vector<16x1xf32> to vector<16x16xf32>
    %101 = vector.broadcast %99 : vector<1x16xf32> to vector<16x16xf32>
    %102 = arith.addf %100, %101 : vector<16x16xf32>
    %cst_28 = arith.constant 0.000000e+00 : f32
    %103 = vector.broadcast %cst_28 : f32 to vector<16x16xf32>
    %104 = arith.cmpf oge, %102, %103 : vector<16x16xf32>
    %cst_29 = arith.constant 2.000000e-01 : f32
    %105 = vector.broadcast %cst_29 : f32 to vector<16x16xf32>
    %106 = arith.mulf %105, %102 : vector<16x16xf32>
    %107 = arith.select %104, %102, %106 : vector<16x16xi1>, vector<16x16xf32>
    %108 = arith.addf %107, %15 : vector<16x16xf32>
    %cst_30 = arith.constant dense<0xFF800000> : vector<16xf32>
    %109 = vector.multi_reduction <maximumf>, %108, %cst_30 [1] : vector<16x16xf32> to vector<16xf32>
    %110 = vector.shape_cast %109 : vector<16xf32> to vector<16x1xf32>
    %111 = vector.broadcast %110 : vector<16x1xf32> to vector<16x16xf32>
    %112 = arith.subf %108, %111 : vector<16x16xf32>
    %113 = math.exp %112 : vector<16x16xf32>
    %cst_31 = arith.constant dense<0.000000e+00> : vector<16xf32>
    %114 = vector.multi_reduction <add>, %113, %cst_31 [1] : vector<16x16xf32> to vector<16xf32>
    %115 = vector.shape_cast %114 : vector<16xf32> to vector<16x1xf32>
    %116 = vector.broadcast %115 : vector<16x1xf32> to vector<16x16xf32>
    %117 = arith.divf %113, %116 : vector<16x16xf32>
    %118 = vector.extract_strided_slice %72 {offsets = [0, 8], sizes = [16, 8], strides = [1, 1]} : vector<16x32xf32> to vector<16x8xf32>
    %cst_32 = arith.constant dense<0.000000e+00> : vector<16x8xf32>
    %119 = tpu.matmul %117, %118, %cst_32 {dimension_numbers = #tpu.dot_dimension_numbers<[1], [0], [0], [1], [0, 0, 1, 1], [], []>} : vector<16x16xf32>, vector<16x8xf32>, vector<16x8xf32> -> vector<16x8xf32>
    %120 = vector.extract_strided_slice %75 {offsets = [0, 2], sizes = [16, 1], strides = [1, 1]} : vector<16x4xf32> to vector<16x1xf32>
    %121 = vector.extract_strided_slice %74 {offsets = [2, 0], sizes = [1, 16], strides = [1, 1]} : vector<4x16xf32> to vector<1x16xf32>
    %122 = vector.broadcast %120 : vector<16x1xf32> to vector<16x16xf32>
    %123 = vector.broadcast %121 : vector<1x16xf32> to vector<16x16xf32>
    %124 = arith.addf %122, %123 : vector<16x16xf32>
    %cst_33 = arith.constant 0.000000e+00 : f32
    %125 = vector.broadcast %cst_33 : f32 to vector<16x16xf32>
    %126 = arith.cmpf oge, %124, %125 : vector<16x16xf32>
    %cst_34 = arith.constant 2.000000e-01 : f32
    %127 = vector.broadcast %cst_34 : f32 to vector<16x16xf32>
    %128 = arith.mulf %127, %124 : vector<16x16xf32>
    %129 = arith.select %126, %124, %128 : vector<16x16xi1>, vector<16x16xf32>
    %130 = arith.addf %129, %15 : vector<16x16xf32>
    %cst_35 = arith.constant dense<0xFF800000> : vector<16xf32>
    %131 = vector.multi_reduction <maximumf>, %130, %cst_35 [1] : vector<16x16xf32> to vector<16xf32>
    %132 = vector.shape_cast %131 : vector<16xf32> to vector<16x1xf32>
    %133 = vector.broadcast %132 : vector<16x1xf32> to vector<16x16xf32>
    %134 = arith.subf %130, %133 : vector<16x16xf32>
    %135 = math.exp %134 : vector<16x16xf32>
    %cst_36 = arith.constant dense<0.000000e+00> : vector<16xf32>
    %136 = vector.multi_reduction <add>, %135, %cst_36 [1] : vector<16x16xf32> to vector<16xf32>
    %137 = vector.shape_cast %136 : vector<16xf32> to vector<16x1xf32>
    %138 = vector.broadcast %137 : vector<16x1xf32> to vector<16x16xf32>
    %139 = arith.divf %135, %138 : vector<16x16xf32>
    %140 = vector.extract_strided_slice %72 {offsets = [0, 16], sizes = [16, 8], strides = [1, 1]} : vector<16x32xf32> to vector<16x8xf32>
    %cst_37 = arith.constant dense<0.000000e+00> : vector<16x8xf32>
    %141 = tpu.matmul %139, %140, %cst_37 {dimension_numbers = #tpu.dot_dimension_numbers<[1], [0], [0], [1], [0, 0, 1, 1], [], []>} : vector<16x16xf32>, vector<16x8xf32>, vector<16x8xf32> -> vector<16x8xf32>
    %142 = vector.extract_strided_slice %75 {offsets = [0, 3], sizes = [16, 1], strides = [1, 1]} : vector<16x4xf32> to vector<16x1xf32>
    %143 = vector.extract_strided_slice %74 {offsets = [3, 0], sizes = [1, 16], strides = [1, 1]} : vector<4x16xf32> to vector<1x16xf32>
    %144 = vector.broadcast %142 : vector<16x1xf32> to vector<16x16xf32>
    %145 = vector.broadcast %143 : vector<1x16xf32> to vector<16x16xf32>
    %146 = arith.addf %144, %145 : vector<16x16xf32>
    %cst_38 = arith.constant 0.000000e+00 : f32
    %147 = vector.broadcast %cst_38 : f32 to vector<16x16xf32>
    %148 = arith.cmpf oge, %146, %147 : vector<16x16xf32>
    %cst_39 = arith.constant 2.000000e-01 : f32
    %149 = vector.broadcast %cst_39 : f32 to vector<16x16xf32>
    %150 = arith.mulf %149, %146 : vector<16x16xf32>
    %151 = arith.select %148, %146, %150 : vector<16x16xi1>, vector<16x16xf32>
    %152 = arith.addf %151, %15 : vector<16x16xf32>
    %cst_40 = arith.constant dense<0xFF800000> : vector<16xf32>
    %153 = vector.multi_reduction <maximumf>, %152, %cst_40 [1] : vector<16x16xf32> to vector<16xf32>
    %154 = vector.shape_cast %153 : vector<16xf32> to vector<16x1xf32>
    %155 = vector.broadcast %154 : vector<16x1xf32> to vector<16x16xf32>
    %156 = arith.subf %152, %155 : vector<16x16xf32>
    %157 = math.exp %156 : vector<16x16xf32>
    %cst_41 = arith.constant dense<0.000000e+00> : vector<16xf32>
    %158 = vector.multi_reduction <add>, %157, %cst_41 [1] : vector<16x16xf32> to vector<16xf32>
    %159 = vector.shape_cast %158 : vector<16xf32> to vector<16x1xf32>
    %160 = vector.broadcast %159 : vector<16x1xf32> to vector<16x16xf32>
    %161 = arith.divf %157, %160 : vector<16x16xf32>
    %162 = vector.extract_strided_slice %72 {offsets = [0, 24], sizes = [16, 8], strides = [1, 1]} : vector<16x32xf32> to vector<16x8xf32>
    %cst_42 = arith.constant dense<0.000000e+00> : vector<16x8xf32>
    %163 = tpu.matmul %161, %162, %cst_42 {dimension_numbers = #tpu.dot_dimension_numbers<[1], [0], [0], [1], [0, 0, 1, 1], [], []>} : vector<16x16xf32>, vector<16x8xf32>, vector<16x8xf32> -> vector<16x8xf32>
    %164 = tpu.concatenate %97, %119, %141, %163 in 1 : vector<16x8xf32>, vector<16x8xf32>, vector<16x8xf32>, vector<16x8xf32> -> vector<16x32xf32>
    %165 = vector.broadcast %71 : vector<1x32xf32> to vector<16x32xf32>
    %166 = arith.addf %164, %165 : vector<16x32xf32>
    %cst_43 = arith.constant 0.000000e+00 : f32
    %167 = vector.broadcast %cst_43 : f32 to vector<16x32xf32>
    %168 = arith.maximumf %166, %167 : vector<16x32xf32>
    %169 = vector.extract_strided_slice %10 {offsets = [8, 0], sizes = [32, 48], strides = [1, 1]} : vector<160x48xf32> to vector<32x48xf32>
    %cst_44 = arith.constant dense<0.000000e+00> : vector<16x48xf32>
    %170 = tpu.matmul %168, %169, %cst_44 {dimension_numbers = #tpu.dot_dimension_numbers<[1], [0], [0], [1], [0, 0, 1, 1], [], []>} : vector<16x32xf32>, vector<32x48xf32>, vector<16x48xf32> -> vector<16x48xf32>
    %171 = vector.extract_strided_slice %170 {offsets = [0, 40], sizes = [16, 1], strides = [1, 1]} : vector<16x48xf32> to vector<16x1xf32>
    %172 = vector.broadcast %4 : f32 to vector<16x1xf32>
    %173 = arith.addf %171, %172 : vector<16x1xf32>
    %174 = vector.extract_strided_slice %10 {offsets = [96, 0], sizes = [32, 1], strides = [1, 1]} : vector<160x48xf32> to vector<32x1xf32>
    %cst_45 = arith.constant 0.000000e+00 : f32
    %175 = vector.broadcast %cst_45 : f32 to vector<16x1xf32>
    %176 = arith.subf %175, %173 : vector<16x1xf32>
    %177 = math.exp %176 : vector<16x1xf32>
    %cst_46 = arith.constant 1.000000e+00 : f32
    %178 = vector.broadcast %cst_46 : f32 to vector<16x1xf32>
    %179 = arith.addf %178, %177 : vector<16x1xf32>
    %cst_47 = arith.constant 1.000000e+00 : f32
    %180 = vector.broadcast %cst_47 : f32 to vector<16x1xf32>
    %181 = arith.divf %180, %179 : vector<16x1xf32>
    %182 = tpu.transpose %181, [1, 0] : vector<16x1xf32> -> vector<1x16xf32>
    %183 = vector.broadcast %182 : vector<1x16xf32> to vector<2x16xf32>
    %184 = arith.addf %183, %20 : vector<2x16xf32>
    %cst_48 = arith.constant dense<0xFF800000> : vector<2xf32>
    %185 = vector.multi_reduction <maximumf>, %184, %cst_48 [1] : vector<2x16xf32> to vector<2xf32>
    %186 = vector.shape_cast %185 : vector<2xf32> to vector<2x1xf32>
    %187 = vector.broadcast %186 : vector<2x1xf32> to vector<2x16xf32>
    %188 = arith.subf %184, %187 : vector<2x16xf32>
    %189 = math.exp %188 : vector<2x16xf32>
    %cst_49 = arith.constant dense<0.000000e+00> : vector<2xf32>
    %190 = vector.multi_reduction <add>, %189, %cst_49 [1] : vector<2x16xf32> to vector<2xf32>
    %191 = vector.shape_cast %190 : vector<2xf32> to vector<2x1xf32>
    %192 = vector.broadcast %191 : vector<2x1xf32> to vector<2x16xf32>
    %193 = arith.divf %189, %192 : vector<2x16xf32>
    %194 = tpu.concatenate %193, %9 in 0 : vector<2x16xf32>, vector<2x16xf32> -> vector<4x16xf32>
    %cst_50 = arith.constant dense<0.000000e+00> : vector<4x32xf32>
    %195 = tpu.matmul %194, %168, %cst_50 {dimension_numbers = #tpu.dot_dimension_numbers<[1], [0], [0], [1], [0, 0, 1, 1], [], []>} : vector<4x16xf32>, vector<16x32xf32>, vector<4x32xf32> -> vector<4x32xf32>
    %196 = vector.extract_strided_slice %195 {offsets = [0, 0], sizes = [2, 32], strides = [1, 1]} : vector<4x32xf32> to vector<2x32xf32>
    %197 = vector.extract_strided_slice %195 {offsets = [2, 0], sizes = [2, 32], strides = [1, 1]} : vector<4x32xf32> to vector<2x32xf32>
    %198 = vector.extract_strided_slice %21 {offsets = [0, 0], sizes = [16, 1], strides = [1, 1]} : vector<16x2xf32> to vector<16x1xf32>
    %199 = vector.broadcast %198 : vector<16x1xf32> to vector<16x32xf32>
    %200 = arith.addf %168, %199 : vector<16x32xf32>
    %cst_51 = arith.constant dense<0xFF800000> : vector<32xf32>
    %201 = vector.multi_reduction <maximumf>, %200, %cst_51 [0] : vector<16x32xf32> to vector<32xf32>
    %202 = vector.shape_cast %201 : vector<32xf32> to vector<1x32xf32>
    %203 = vector.extract_strided_slice %21 {offsets = [0, 1], sizes = [16, 1], strides = [1, 1]} : vector<16x2xf32> to vector<16x1xf32>
    %204 = vector.broadcast %203 : vector<16x1xf32> to vector<16x32xf32>
    %205 = arith.addf %168, %204 : vector<16x32xf32>
    %cst_52 = arith.constant dense<0xFF800000> : vector<32xf32>
    %206 = vector.multi_reduction <maximumf>, %205, %cst_52 [0] : vector<16x32xf32> to vector<32xf32>
    %207 = vector.shape_cast %206 : vector<32xf32> to vector<1x32xf32>
    %208 = tpu.concatenate %202, %207 in 0 : vector<1x32xf32>, vector<1x32xf32> -> vector<2x32xf32>
    %209 = vector.broadcast %0 : f32 to vector<2x32xf32>
    %210 = arith.mulf %209, %196 : vector<2x32xf32>
    %211 = vector.broadcast %1 : f32 to vector<2x32xf32>
    %212 = arith.mulf %211, %197 : vector<2x32xf32>
    %213 = arith.addf %210, %212 : vector<2x32xf32>
    %214 = vector.broadcast %2 : f32 to vector<2x32xf32>
    %215 = arith.mulf %214, %208 : vector<2x32xf32>
    %216 = arith.addf %213, %215 : vector<2x32xf32>
    %cst_53 = arith.constant dense<0.000000e+00> : vector<2x1xf32>
    %217 = tpu.matmul %216, %174, %cst_53 {dimension_numbers = #tpu.dot_dimension_numbers<[1], [0], [0], [1], [0, 0, 1, 1], [], []>} : vector<2x32xf32>, vector<32x1xf32>, vector<2x1xf32> -> vector<2x1xf32>
    %218 = vector.extract_strided_slice %10 {offsets = [80, 0], sizes = [1, 32], strides = [1, 1]} : vector<160x48xf32> to vector<1x32xf32>
    %219 = vector.extract_strided_slice %170 {offsets = [0, 0], sizes = [16, 32], strides = [1, 1]} : vector<16x48xf32> to vector<16x32xf32>
    %220 = vector.extract_strided_slice %170 {offsets = [0, 32], sizes = [16, 4], strides = [1, 1]} : vector<16x48xf32> to vector<16x4xf32>
    %221 = tpu.transpose %220, [1, 0] : vector<16x4xf32> -> vector<4x16xf32>
    %222 = vector.extract_strided_slice %170 {offsets = [0, 36], sizes = [16, 4], strides = [1, 1]} : vector<16x48xf32> to vector<16x4xf32>
    %223 = vector.extract_strided_slice %222 {offsets = [0, 0], sizes = [16, 1], strides = [1, 1]} : vector<16x4xf32> to vector<16x1xf32>
    %224 = vector.extract_strided_slice %221 {offsets = [0, 0], sizes = [1, 16], strides = [1, 1]} : vector<4x16xf32> to vector<1x16xf32>
    %225 = vector.broadcast %223 : vector<16x1xf32> to vector<16x16xf32>
    %226 = vector.broadcast %224 : vector<1x16xf32> to vector<16x16xf32>
    %227 = arith.addf %225, %226 : vector<16x16xf32>
    %cst_54 = arith.constant 0.000000e+00 : f32
    %228 = vector.broadcast %cst_54 : f32 to vector<16x16xf32>
    %229 = arith.cmpf oge, %227, %228 : vector<16x16xf32>
    %cst_55 = arith.constant 2.000000e-01 : f32
    %230 = vector.broadcast %cst_55 : f32 to vector<16x16xf32>
    %231 = arith.mulf %230, %227 : vector<16x16xf32>
    %232 = arith.select %229, %227, %231 : vector<16x16xi1>, vector<16x16xf32>
    %233 = arith.addf %232, %15 : vector<16x16xf32>
    %cst_56 = arith.constant dense<0xFF800000> : vector<16xf32>
    %234 = vector.multi_reduction <maximumf>, %233, %cst_56 [1] : vector<16x16xf32> to vector<16xf32>
    %235 = vector.shape_cast %234 : vector<16xf32> to vector<16x1xf32>
    %236 = vector.broadcast %235 : vector<16x1xf32> to vector<16x16xf32>
    %237 = arith.subf %233, %236 : vector<16x16xf32>
    %238 = math.exp %237 : vector<16x16xf32>
    %cst_57 = arith.constant dense<0.000000e+00> : vector<16xf32>
    %239 = vector.multi_reduction <add>, %238, %cst_57 [1] : vector<16x16xf32> to vector<16xf32>
    %240 = vector.shape_cast %239 : vector<16xf32> to vector<16x1xf32>
    %241 = vector.broadcast %240 : vector<16x1xf32> to vector<16x16xf32>
    %242 = arith.divf %238, %241 : vector<16x16xf32>
    %243 = vector.extract_strided_slice %219 {offsets = [0, 0], sizes = [16, 8], strides = [1, 1]} : vector<16x32xf32> to vector<16x8xf32>
    %cst_58 = arith.constant dense<0.000000e+00> : vector<16x8xf32>
    %244 = tpu.matmul %242, %243, %cst_58 {dimension_numbers = #tpu.dot_dimension_numbers<[1], [0], [0], [1], [0, 0, 1, 1], [], []>} : vector<16x16xf32>, vector<16x8xf32>, vector<16x8xf32> -> vector<16x8xf32>
    %245 = vector.extract_strided_slice %222 {offsets = [0, 1], sizes = [16, 1], strides = [1, 1]} : vector<16x4xf32> to vector<16x1xf32>
    %246 = vector.extract_strided_slice %221 {offsets = [1, 0], sizes = [1, 16], strides = [1, 1]} : vector<4x16xf32> to vector<1x16xf32>
    %247 = vector.broadcast %245 : vector<16x1xf32> to vector<16x16xf32>
    %248 = vector.broadcast %246 : vector<1x16xf32> to vector<16x16xf32>
    %249 = arith.addf %247, %248 : vector<16x16xf32>
    %cst_59 = arith.constant 0.000000e+00 : f32
    %250 = vector.broadcast %cst_59 : f32 to vector<16x16xf32>
    %251 = arith.cmpf oge, %249, %250 : vector<16x16xf32>
    %cst_60 = arith.constant 2.000000e-01 : f32
    %252 = vector.broadcast %cst_60 : f32 to vector<16x16xf32>
    %253 = arith.mulf %252, %249 : vector<16x16xf32>
    %254 = arith.select %251, %249, %253 : vector<16x16xi1>, vector<16x16xf32>
    %255 = arith.addf %254, %15 : vector<16x16xf32>
    %cst_61 = arith.constant dense<0xFF800000> : vector<16xf32>
    %256 = vector.multi_reduction <maximumf>, %255, %cst_61 [1] : vector<16x16xf32> to vector<16xf32>
    %257 = vector.shape_cast %256 : vector<16xf32> to vector<16x1xf32>
    %258 = vector.broadcast %257 : vector<16x1xf32> to vector<16x16xf32>
    %259 = arith.subf %255, %258 : vector<16x16xf32>
    %260 = math.exp %259 : vector<16x16xf32>
    %cst_62 = arith.constant dense<0.000000e+00> : vector<16xf32>
    %261 = vector.multi_reduction <add>, %260, %cst_62 [1] : vector<16x16xf32> to vector<16xf32>
    %262 = vector.shape_cast %261 : vector<16xf32> to vector<16x1xf32>
    %263 = vector.broadcast %262 : vector<16x1xf32> to vector<16x16xf32>
    %264 = arith.divf %260, %263 : vector<16x16xf32>
    %265 = vector.extract_strided_slice %219 {offsets = [0, 8], sizes = [16, 8], strides = [1, 1]} : vector<16x32xf32> to vector<16x8xf32>
    %cst_63 = arith.constant dense<0.000000e+00> : vector<16x8xf32>
    %266 = tpu.matmul %264, %265, %cst_63 {dimension_numbers = #tpu.dot_dimension_numbers<[1], [0], [0], [1], [0, 0, 1, 1], [], []>} : vector<16x16xf32>, vector<16x8xf32>, vector<16x8xf32> -> vector<16x8xf32>
    %267 = vector.extract_strided_slice %222 {offsets = [0, 2], sizes = [16, 1], strides = [1, 1]} : vector<16x4xf32> to vector<16x1xf32>
    %268 = vector.extract_strided_slice %221 {offsets = [2, 0], sizes = [1, 16], strides = [1, 1]} : vector<4x16xf32> to vector<1x16xf32>
    %269 = vector.broadcast %267 : vector<16x1xf32> to vector<16x16xf32>
    %270 = vector.broadcast %268 : vector<1x16xf32> to vector<16x16xf32>
    %271 = arith.addf %269, %270 : vector<16x16xf32>
    %cst_64 = arith.constant 0.000000e+00 : f32
    %272 = vector.broadcast %cst_64 : f32 to vector<16x16xf32>
    %273 = arith.cmpf oge, %271, %272 : vector<16x16xf32>
    %cst_65 = arith.constant 2.000000e-01 : f32
    %274 = vector.broadcast %cst_65 : f32 to vector<16x16xf32>
    %275 = arith.mulf %274, %271 : vector<16x16xf32>
    %276 = arith.select %273, %271, %275 : vector<16x16xi1>, vector<16x16xf32>
    %277 = arith.addf %276, %15 : vector<16x16xf32>
    %cst_66 = arith.constant dense<0xFF800000> : vector<16xf32>
    %278 = vector.multi_reduction <maximumf>, %277, %cst_66 [1] : vector<16x16xf32> to vector<16xf32>
    %279 = vector.shape_cast %278 : vector<16xf32> to vector<16x1xf32>
    %280 = vector.broadcast %279 : vector<16x1xf32> to vector<16x16xf32>
    %281 = arith.subf %277, %280 : vector<16x16xf32>
    %282 = math.exp %281 : vector<16x16xf32>
    %cst_67 = arith.constant dense<0.000000e+00> : vector<16xf32>
    %283 = vector.multi_reduction <add>, %282, %cst_67 [1] : vector<16x16xf32> to vector<16xf32>
    %284 = vector.shape_cast %283 : vector<16xf32> to vector<16x1xf32>
    %285 = vector.broadcast %284 : vector<16x1xf32> to vector<16x16xf32>
    %286 = arith.divf %282, %285 : vector<16x16xf32>
    %287 = vector.extract_strided_slice %219 {offsets = [0, 16], sizes = [16, 8], strides = [1, 1]} : vector<16x32xf32> to vector<16x8xf32>
    %cst_68 = arith.constant dense<0.000000e+00> : vector<16x8xf32>
    %288 = tpu.matmul %286, %287, %cst_68 {dimension_numbers = #tpu.dot_dimension_numbers<[1], [0], [0], [1], [0, 0, 1, 1], [], []>} : vector<16x16xf32>, vector<16x8xf32>, vector<16x8xf32> -> vector<16x8xf32>
    %289 = vector.extract_strided_slice %222 {offsets = [0, 3], sizes = [16, 1], strides = [1, 1]} : vector<16x4xf32> to vector<16x1xf32>
    %290 = vector.extract_strided_slice %221 {offsets = [3, 0], sizes = [1, 16], strides = [1, 1]} : vector<4x16xf32> to vector<1x16xf32>
    %291 = vector.broadcast %289 : vector<16x1xf32> to vector<16x16xf32>
    %292 = vector.broadcast %290 : vector<1x16xf32> to vector<16x16xf32>
    %293 = arith.addf %291, %292 : vector<16x16xf32>
    %cst_69 = arith.constant 0.000000e+00 : f32
    %294 = vector.broadcast %cst_69 : f32 to vector<16x16xf32>
    %295 = arith.cmpf oge, %293, %294 : vector<16x16xf32>
    %cst_70 = arith.constant 2.000000e-01 : f32
    %296 = vector.broadcast %cst_70 : f32 to vector<16x16xf32>
    %297 = arith.mulf %296, %293 : vector<16x16xf32>
    %298 = arith.select %295, %293, %297 : vector<16x16xi1>, vector<16x16xf32>
    %299 = arith.addf %298, %15 : vector<16x16xf32>
    %cst_71 = arith.constant dense<0xFF800000> : vector<16xf32>
    %300 = vector.multi_reduction <maximumf>, %299, %cst_71 [1] : vector<16x16xf32> to vector<16xf32>
    %301 = vector.shape_cast %300 : vector<16xf32> to vector<16x1xf32>
    %302 = vector.broadcast %301 : vector<16x1xf32> to vector<16x16xf32>
    %303 = arith.subf %299, %302 : vector<16x16xf32>
    %304 = math.exp %303 : vector<16x16xf32>
    %cst_72 = arith.constant dense<0.000000e+00> : vector<16xf32>
    %305 = vector.multi_reduction <add>, %304, %cst_72 [1] : vector<16x16xf32> to vector<16xf32>
    %306 = vector.shape_cast %305 : vector<16xf32> to vector<16x1xf32>
    %307 = vector.broadcast %306 : vector<16x1xf32> to vector<16x16xf32>
    %308 = arith.divf %304, %307 : vector<16x16xf32>
    %309 = vector.extract_strided_slice %219 {offsets = [0, 24], sizes = [16, 8], strides = [1, 1]} : vector<16x32xf32> to vector<16x8xf32>
    %cst_73 = arith.constant dense<0.000000e+00> : vector<16x8xf32>
    %310 = tpu.matmul %308, %309, %cst_73 {dimension_numbers = #tpu.dot_dimension_numbers<[1], [0], [0], [1], [0, 0, 1, 1], [], []>} : vector<16x16xf32>, vector<16x8xf32>, vector<16x8xf32> -> vector<16x8xf32>
    %311 = tpu.concatenate %244, %266, %288, %310 in 1 : vector<16x8xf32>, vector<16x8xf32>, vector<16x8xf32>, vector<16x8xf32> -> vector<16x32xf32>
    %312 = vector.broadcast %218 : vector<1x32xf32> to vector<16x32xf32>
    %313 = arith.addf %311, %312 : vector<16x32xf32>
    %314 = vector.extract_strided_slice %10 {offsets = [40, 0], sizes = [32, 1], strides = [1, 1]} : vector<160x48xf32> to vector<32x1xf32>
    %cst_74 = arith.constant dense<0.000000e+00> : vector<16x1xf32>
    %315 = tpu.matmul %313, %314, %cst_74 {dimension_numbers = #tpu.dot_dimension_numbers<[1], [0], [0], [1], [0, 0, 1, 1], [], []>} : vector<16x32xf32>, vector<32x1xf32>, vector<16x1xf32> -> vector<16x1xf32>
    %316 = vector.broadcast %5 : f32 to vector<16x1xf32>
    %317 = arith.addf %315, %316 : vector<16x1xf32>
    %318 = vector.extract_strided_slice %10 {offsets = [128, 0], sizes = [32, 1], strides = [1, 1]} : vector<160x48xf32> to vector<32x1xf32>
    %cst_75 = arith.constant 0.000000e+00 : f32
    %319 = vector.broadcast %cst_75 : f32 to vector<16x1xf32>
    %320 = arith.subf %319, %317 : vector<16x1xf32>
    %321 = math.exp %320 : vector<16x1xf32>
    %cst_76 = arith.constant 1.000000e+00 : f32
    %322 = vector.broadcast %cst_76 : f32 to vector<16x1xf32>
    %323 = arith.addf %322, %321 : vector<16x1xf32>
    %cst_77 = arith.constant 1.000000e+00 : f32
    %324 = vector.broadcast %cst_77 : f32 to vector<16x1xf32>
    %325 = arith.divf %324, %323 : vector<16x1xf32>
    %326 = tpu.transpose %325, [1, 0] : vector<16x1xf32> -> vector<1x16xf32>
    %327 = vector.broadcast %326 : vector<1x16xf32> to vector<2x16xf32>
    %328 = arith.addf %327, %20 : vector<2x16xf32>
    %cst_78 = arith.constant dense<0xFF800000> : vector<2xf32>
    %329 = vector.multi_reduction <maximumf>, %328, %cst_78 [1] : vector<2x16xf32> to vector<2xf32>
    %330 = vector.shape_cast %329 : vector<2xf32> to vector<2x1xf32>
    %331 = vector.broadcast %330 : vector<2x1xf32> to vector<2x16xf32>
    %332 = arith.subf %328, %331 : vector<2x16xf32>
    %333 = math.exp %332 : vector<2x16xf32>
    %cst_79 = arith.constant dense<0.000000e+00> : vector<2xf32>
    %334 = vector.multi_reduction <add>, %333, %cst_79 [1] : vector<2x16xf32> to vector<2xf32>
    %335 = vector.shape_cast %334 : vector<2xf32> to vector<2x1xf32>
    %336 = vector.broadcast %335 : vector<2x1xf32> to vector<2x16xf32>
    %337 = arith.divf %333, %336 : vector<2x16xf32>
    %338 = tpu.concatenate %337, %9 in 0 : vector<2x16xf32>, vector<2x16xf32> -> vector<4x16xf32>
    %cst_80 = arith.constant dense<0.000000e+00> : vector<4x32xf32>
    %339 = tpu.matmul %338, %313, %cst_80 {dimension_numbers = #tpu.dot_dimension_numbers<[1], [0], [0], [1], [0, 0, 1, 1], [], []>} : vector<4x16xf32>, vector<16x32xf32>, vector<4x32xf32> -> vector<4x32xf32>
    %340 = vector.extract_strided_slice %339 {offsets = [0, 0], sizes = [2, 32], strides = [1, 1]} : vector<4x32xf32> to vector<2x32xf32>
    %341 = vector.extract_strided_slice %339 {offsets = [2, 0], sizes = [2, 32], strides = [1, 1]} : vector<4x32xf32> to vector<2x32xf32>
    %342 = vector.extract_strided_slice %21 {offsets = [0, 0], sizes = [16, 1], strides = [1, 1]} : vector<16x2xf32> to vector<16x1xf32>
    %343 = vector.broadcast %342 : vector<16x1xf32> to vector<16x32xf32>
    %344 = arith.addf %313, %343 : vector<16x32xf32>
    %cst_81 = arith.constant dense<0xFF800000> : vector<32xf32>
    %345 = vector.multi_reduction <maximumf>, %344, %cst_81 [0] : vector<16x32xf32> to vector<32xf32>
    %346 = vector.shape_cast %345 : vector<32xf32> to vector<1x32xf32>
    %347 = vector.extract_strided_slice %21 {offsets = [0, 1], sizes = [16, 1], strides = [1, 1]} : vector<16x2xf32> to vector<16x1xf32>
    %348 = vector.broadcast %347 : vector<16x1xf32> to vector<16x32xf32>
    %349 = arith.addf %313, %348 : vector<16x32xf32>
    %cst_82 = arith.constant dense<0xFF800000> : vector<32xf32>
    %350 = vector.multi_reduction <maximumf>, %349, %cst_82 [0] : vector<16x32xf32> to vector<32xf32>
    %351 = vector.shape_cast %350 : vector<32xf32> to vector<1x32xf32>
    %352 = tpu.concatenate %346, %351 in 0 : vector<1x32xf32>, vector<1x32xf32> -> vector<2x32xf32>
    %353 = vector.broadcast %0 : f32 to vector<2x32xf32>
    %354 = arith.mulf %353, %340 : vector<2x32xf32>
    %355 = vector.broadcast %1 : f32 to vector<2x32xf32>
    %356 = arith.mulf %355, %341 : vector<2x32xf32>
    %357 = arith.addf %354, %356 : vector<2x32xf32>
    %358 = vector.broadcast %2 : f32 to vector<2x32xf32>
    %359 = arith.mulf %358, %352 : vector<2x32xf32>
    %360 = arith.addf %357, %359 : vector<2x32xf32>
    %cst_83 = arith.constant dense<0.000000e+00> : vector<2x1xf32>
    %361 = tpu.matmul %360, %318, %cst_83 {dimension_numbers = #tpu.dot_dimension_numbers<[1], [0], [0], [1], [0, 0, 1, 1], [], []>} : vector<2x32xf32>, vector<32x1xf32>, vector<2x1xf32> -> vector<2x1xf32>
    %362 = arith.addf %70, %217 : vector<2x1xf32>
    %363 = arith.addf %362, %361 : vector<2x1xf32>
    %364 = vector.broadcast %6 : f32 to vector<2x1xf32>
    %365 = arith.addf %363, %364 : vector<2x1xf32>
    %c0_84 = arith.constant 0 : index
    %c0_85 = arith.constant 0 : index
    %366 = vector.load %arg5[%c0_84, %c0_85] : memref<2x1xf32, #tpu.memory_space<vmem>>, vector<2x1xf32>
    tpu.vector_store %arg5[%c0_84, %c0_85], %365 {strides = array<i32>} : memref<2x1xf32, #tpu.memory_space<vmem>>, vector<2x1xf32>,
    return
  }
}

</mosaic_0001>

<bundles_post_ra>
// kernel: tpu_custom_call.1
= control target key start
LH: loop header
LB: loop body
LE: loop exit
PB: predicated region body
PF: predicated region fallthrough
CT: control target
= control target key end

     0   :  { %10 = vsyncpa [#allocation3], 0  ;;  %s3286_s0 = inlined_call_operand.vmem [shape: f32[7], index: 0, kind: input, shape index: {}]   ;;  %s3287_s1 = inlined_call_operand.vmem [shape: f32[16,8], index: 1, kind: input, shape index: {}]   ;;  %s3288_s2 = inlined_call_operand.vmem [shape: f32[16,16], index: 2, kind: input, shape index: {}]   ;;  %s3289_s3 = inlined_call_operand.vmem [shape: f32[2,16], index: 3, kind: input, shape index: {}]   ;;  %s3290_s4 = inlined_call_operand.vmem [shape: f32[160,48], index: 4, kind: input, shape index: {}]   ;;  %s3291_s5 = inlined_call_operand.vmem [shape: f32[2,1], index: 5, kind: output, shape index: {}]  }
   0x1   :  { %s17_s20 = sshll.u32 %s3286_s0, 4  ;;  %s18_s20 = int_to_ptr.vmem [resolvable:$true] %s17_s20 }
   0x2   :  { %s2684_s21 = scalar_lea.vmem %s18_s20, 16  ;;  %p2689_p1 = scmp.lt.s32.totalorder %s18_s20, %s18_s20 }
   0x3   :  { %p2685_p0 = scmp.ne.s32.totalorder %s18_s20, %s2684_s21  ;;  %p2690_p2 = scmp.lt.s32.totalorder %s2684_s21, %s2684_s21 }
   0x5   :  { %p2691_p3 = por %p2690_p2, %p2689_p1 }
   0x7   :  { %p2692_p4 = pnand %p2691_p3, %p2685_p0 }
   0x9   :  { %2695 = shalt.err (!%p2692_p4)
}
   0xa   :  { %s2698_s22 = smov [#allocation2]  }
   0xb   :  { %20 = dma.vmem_to_smem %s18_s20, 16, %s2698_s22, [#allocation3]  }
   0xc   :  { %2696 = dma.done.wait [#allocation3], 16  }
   0xd   :  { %2697 = vsyncadd [#allocation3], 4294967280 }
   0xe   :  { %32 = sfence }
   0xf   :  { %v45_v0 = vld [vmem:[%s3290_s4] sm:$0xff]  ;;  %vm103_vm0 = vcmask 64512   ;;  %v2760_v2 = vld [vmem:[%s3287_s1 + $0x8] sm:$0xff]  ;;  %v2699_v3 = vmov 36   ;;  %s2316_s28 = sld [smem:[#allocation2 + $0x3]]  ;;  %s2700_s29 = smov 96   ;;  %v240_v30 = vlaneseq }
  0x10   :  { %v2755_v1 = vld [vmem:[%s3287_s1] sm:$0xff]  ;;  %2416 = vmatprep.subr.mxu0 %v45_v0  ;;  %2565 = vset.pattern.permute.xlu1 %v2699_v3  ;;  %v2701_v13 = vmov 37   ;;  %v2702_v14 = vmov 38   ;;  %s2703_s30 = smov 88   ;;  %v2704_v21 = vmov 39   ;;  %v43_v38 = vld [vmem:[%s3288_s2 + $0x8] sm:$0xff] }
  0x11   :  { %2418 = vmatprep.mubr.msk.f32.mxu0 %vm103_vm0, %v2755_v1  ;;  %2417 = vmatpush3.msra.mxu0 %v45_v0  ;;  %v2795_v32 = vshrl.u32 %v240_v30, 7  ;;  %v42_v37 = vld [vmem:[%s3288_s2] sm:$0xff]  ;;  %vm66_vm2 = vcmp.gt.f32.partialorder %v43_v38, 0.0  ;;  %v2705_v50 = vmov -1e+30   ;;  %vm262_vm5 = vcmask 130048  }
  0x12   :  { %2419 = vmatmul.mubr.msk.f32.vlgmr.msra.gmra.mxu0 %vm103_vm0, %v2760_v2  ;;  %2566 = vset.pattern.permute.xlu0 %v2699_v3  ;;  %vm65_vm1 = vcmp.gt.f32.partialorder %v42_v37, 0.0  ;;  %v2820_v52 = vsel %vm66_vm2, 0.0, %v2705_v50  ;;  %vm245_vm11 = vcmask 123904   ;;  %s2707_s11 = smov 112   ;;  %s2709_s12 = smov 104   ;;  %vm2710_vm14 = vmmov 0  }
  0x13   :  { %v2800_v34 = vsub.s32 0, %v2795_v32  ;;  %v564_v35 = vsub.s32 1, %v2795_v32  ;;  %v695_v36 = vsub.s32 2, %v2795_v32  ;;  %v826_v39 = vsub.s32 3, %v2795_v32  ;;  %s2711_s13 = smov 16   ;;  %s2712_s22 = smov 8  }
  0x14   :  { %v2818_v51 = vsel %vm65_vm1, 0.0, %v2705_v50  ;;  %vm260_vm15 = vcmask 1041408   ;;  %s2713_s23 = smov 24   ;;  %vm975_vm1 = vcmask 195584   ;;  %vm986_vm2 = vcmask 261120   ;;  %s2317_s26 = sld [smem:[#allocation2 + $0x4]] }
  0x15   :  { %v185_v4 = vstv %s2316_s28  ;;  %s2314_s9 = sld [smem:[#allocation2 + $0x1]] }
  0x16   :  { %s33_s2 = sld [smem:[#allocation2]] }
  0x17   :  { %s2315_s10 = sld [smem:[#allocation2 + $0x2]] }
  0x18   :  { %s2318_s25 = sld [smem:[#allocation2 + $0x5]] }
  0x19   :  { %s2319_s8 = sld [smem:[#allocation2 + $0x6]] }
  0xd2   :  { %v2766_v5 = vpop.f32.mrf.mxu0 }
  0xd3   :  { %v187_v6 = vadd.f32 %v2766_v5, %v185_v4  ;;  %393 = vrot.lane.b32.xlu1 %v2766_v5, %s2700_s29  ;;  %2428 = vmatprep.subr.mxu0 %v2766_v5 }
  0xd4   :  { %v2772_v7 = vpop.f32.mrf.mxu0  ;;  %2429 = vmatpush3.msra.mxu0 %v2766_v5 }
  0xd5   :  { %v186_v8 = vadd.f32 %v185_v4, %v2772_v7  ;;  %391 = vrot.lane.b32.xlu0 %v2772_v7, %s2700_s29  ;;  %2430 = vmatprep.subr.mxu0 %v2772_v7  ;;  %v189_v9 = vsub.f32 0.0, %v187_v6 }
  0xd6   :  { %2431 = vmatpush3.msra.mxu0 %v2772_v7 }
  0xd7   :  { %434 = vperm.xlu1 %2565, %v2766_v5   ;;  %v192_v10 = vmul.f32 1.442695, %v189_v9  ;;  %v188_v11 = vsub.f32 0.0, %v186_v8 }
  0xd9   :  { %430 = vperm.xlu0 %2566, %v2772_v7   ;;  %2582 = vpow2.f32 %v192_v10  ;;  %v190_v12 = vmul.f32 1.442695, %v188_v11 }
  0xdb   :  { %2567 = vset.pattern.permute.xlu1 %v2701_v13  ;;  %2584 = vpow2.f32 %v190_v12 }
  0xdc   :  { %555 = vperm.xlu1 %2567, %v2772_v7  }
  0xdd   :  { %2568 = vset.pattern.permute.xlu0 %v2701_v13 }
  0xe0   :  { %2569 = vset.pattern.permute.xlu1 %v2702_v14 }
  0xe6   :  { %v2583_v15 = vpop.eup %2582 }
  0xe7   :  { %v195_v16 = vadd.f32 1.0, %v2583_v15 }
  0xe8   :  { %v2585_v17 = vpop.eup %2584 }
  0xe9   :  { %2586 = vrcp.f32 %v195_v16  ;;  %v194_v18 = vadd.f32 1.0, %v2585_v17 }
  0xeb   :  { %2588 = vrcp.f32 %v194_v18  ;;  %v2850_v18 = vld [vmem:[%s3289_s3] sm:$0x3]  ;;  %s2706_s3 = smov 120  }
  0xec   :  { %vm69_vm9 = vcmp.gt.f32.partialorder %v2850_v18, 0.0 }
  0xf6   :  { %v2587_v19 = vpop.eup %2586 }
  0xf7   :  { %204 = vrot.lane.b32.xlu1 %v2587_v19, %s2703_s30 }
  0xf8   :  { %v2589_v20 = vpop.eup %2588 }
  0xf9   :  { %202 = vrot.lane.b32.xlu0 %v2589_v20, %s2703_s30 }
  0xfb   :  { %686 = vperm.xlu1 %2569, %v2772_v7  }
  0xfd   :  { %559 = vperm.xlu0 %2568, %v2766_v5  }
  0xff   :  { %690 = vperm.xlu1 %2569, %v2766_v5  }
 0x101   :  { %2570 = vset.pattern.permute.xlu0 %v2704_v21 }
 0x102   :  { %817 = vperm.xlu0 %2570, %v2772_v7  }
 0x103   :  { %2571 = vset.pattern.permute.xlu1 %v2704_v21 }
 0x104   :  { %821 = vperm.xlu1 %2571, %v2766_v5  }
 0x145   :  { %v394_v23 = vpop.permute.xlu1 %393 }
 0x147   :  { %v392_v22 = vpop.permute.xlu0 %391 }
 0x148   :  { %397 = vxpose.xlu1.b32.start [1/2] (short) (narrow) %v392_v22, 8 }
 0x14c   :  { %398 = vxpose.xlu1.b32.end [2/2] (short) (narrow) %v394_v23, 8  ;;  %v2853_v23 = vsel %vm69_vm9, 0.0, %v2705_v50 }
 0x152   :  { %v435_v24 = vpop.permute.xlu1 %434 }
 0x154   :  { %v431_v25 = vpop.permute.xlu0 %430 }
 0x157   :  { %v556_v26 = vpop.permute.xlu1 %555 }
 0x169   :  { %v205_v28 = vpop.permute.xlu1 %204 }
 0x16b   :  { %v203_v27 = vpop.permute.xlu0 %202 }
 0x16c   :  { %208 = vxpose.xlu0.b32.start [1/2] (short) (narrow) %v203_v27, 8 }
 0x170   :  { %209 = vxpose.xlu0.b32.end [2/2] (short) (narrow) %v205_v28, 8 }
 0x176   :  { %v687_v29 = vpop.permute.xlu1 %686 }
 0x178   :  { %v560_v40 = vpop.permute.xlu0 %559 }
 0x17a   :  { %v691_v31 = vpop.permute.xlu1 %690 }
 0x17d   :  { %v818_v55 = vpop.permute.xlu0 %817 }
 0x17f   :  { %v2797_v33 = vpop.permute.xlu1 %821 }
 0x199   :  { %2572 = vset.pattern.permute.xlu0 %v2699_v3 }
 0x1c4   :  { %v413_v41 = vpop.trf.xlu1 }
 0x1c5   :  { %v440_v42 = vrot.slane %v413_v41, %v2800_v34  ;;  %v565_v43 = vrot.slane %v413_v41, %v564_v35  ;;  %v696_v44 = vrot.slane %v413_v41, %v695_v36  ;;  %v827_v48 = vrot.slane %v413_v41, %v826_v39 }
 0x1c7   :  { %v441_v45 = vadd.f32 %v440_v42, %v431_v25  ;;  %v442_v46 = vadd.f32 %v440_v42, %v435_v24  ;;  %v566_v47 = vadd.f32 %v565_v43, %v556_v26  ;;  %v697_v49 = vadd.f32 %v696_v44, %v687_v29 }
 0x1c8   :  { %v828_v57 = vadd.f32 %v827_v48, %v818_v55  ;;  %v567_v17 = vadd.f32 %v565_v43, %v560_v40  ;;  %v698_v19 = vadd.f32 %v696_v44, %v691_v31  ;;  %v829_v25 = vadd.f32 %v827_v48, %v2797_v33 }
 0x1c9   :  { %vm443_vm3 = vcmp.ge.f32.partialorder %v441_v45, 0.0  ;;  %v445_v53 = vmul.f32 0.2, %v441_v45  ;;  %vm444_vm4 = vcmp.ge.f32.partialorder %v442_v46, 0.0  ;;  %v446_v54 = vmul.f32 0.2, %v442_v46 }
 0x1ca   :  { %vm568_vm6 = vcmp.ge.f32.partialorder %v566_v47, 0.0  ;;  %v570_v56 = vmul.f32 0.2, %v566_v47  ;;  %v701_v60 = vmul.f32 0.2, %v697_v49  ;;  %vm699_vm7 = vcmp.ge.f32.partialorder %v697_v49, 0.0 }
 0x1cb   :  { %v447_v58 = vsel %vm443_vm3, %v441_v45, %v445_v53  ;;  %v448_v59 = vsel %vm444_vm4, %v442_v46, %v446_v54  ;;  %v832_v8 = vmul.f32 0.2, %v828_v57  ;;  %vm830_vm8 = vcmp.ge.f32.partialorder %v828_v57, 0.0 }
 0x1cc   :  { %v2823_v61 = vadd.f32 %v447_v58, %v2818_v51  ;;  %v2826_v62 = vadd.f32 %v448_v59, %v2820_v52  ;;  %v572_v63 = vsel %vm568_vm6, %v566_v47, %v570_v56  ;;  %v703_v6 = vsel %vm699_vm7, %v697_v49, %v701_v60 }
 0x1cd   :  { %v2833_v4 = vadd.f32 %v572_v63, %v2818_v51  ;;  %v2838_v10 = vadd.f32 %v703_v6, %v2818_v51  ;;  %v834_v11 = vsel %vm830_vm8, %v828_v57, %v832_v8  ;;  %v571_v20 = vmul.f32 0.2, %v567_v17 }
 0x1ce   :  { %v451_v0 = vsel %vm262_vm5, %v2823_v61, -inf  ;;  %v454_v3 = vsel %vm262_vm5, %v2826_v62, -inf  ;;  %v2843_v15 = vadd.f32 %v834_v11, %v2818_v51  ;;  %vm569_vm10 = vcmp.ge.f32.partialorder %v567_v17, 0.0 }
 0x1cf   :  { %452 = vmax.xlane.f32.xlu1 %v451_v0  ;;  %455 = vmax.xlane.f32.xlu0 %v454_v3  ;;  %v576_v9 = vsel %vm262_vm5, %v2833_v4, -inf  ;;  %v707_v12 = vsel %vm262_vm5, %v2838_v10, -inf  ;;  %v573_v26 = vsel %vm569_vm10, %v567_v17, %v571_v20  ;;  %v702_v27 = vmul.f32 0.2, %v698_v19 }
 0x1d0   :  { %v838_v16 = vsel %vm262_vm5, %v2843_v15, -inf  ;;  %vm700_vm12 = vcmp.ge.f32.partialorder %v698_v19, 0.0  ;;  %v2865_v30 = vadd.f32 %v573_v26, %v2820_v52  ;;  %v833_v33 = vmul.f32 0.2, %v829_v25 }
 0x1d1   :  { %v704_v31 = vsel %vm700_vm12, %v698_v19, %v702_v27  ;;  %vm831_vm13 = vcmp.ge.f32.partialorder %v829_v25, 0.0  ;;  %v2708_v44 = vmov 0.0  }
 0x1d2   :  { %v579_v37 = vsel %vm262_vm5, %v2865_v30, -inf  ;;  %v706_v38 = vadd.f32 %v704_v31, %v2820_v52  ;;  %v835_v40 = vsel %vm831_vm13, %v829_v25, %v833_v33  ;;  %2421 = vmatprep.subr.mxu1 %v2708_v44  ;;  %2425 = vmatprep.mubr.msk.f32.mxu1 %vm2710_vm14, %v2708_v44  ;;  %vm376_vm13 = vcmask 1040384  }
 0x1d3   :  { %577 = vmax.xlane.f32.xlu1 %v576_v9  ;;  %v2874_v42 = vadd.f32 %v835_v40, %v2820_v52  ;;  %2422 = vmatpush3.msra.mxu1 %v2760_v2 }
 0x1d4   :  { %v710_v41 = vsel %vm262_vm5, %v706_v38, -inf  ;;  %2423 = vmatprep.subr.mxu1 %v2708_v44 }
 0x1d5   :  { %v841_v43 = vsel %vm262_vm5, %v2874_v42, -inf  ;;  %2424 = vmatpush3.msra.mxu1 %v2755_v1 }
 0x1d7   :  { %708 = vmax.xlane.f32.xlu1 %v707_v12 }
 0x1db   :  { %839 = vmax.xlane.f32.xlu1 %v838_v16 }
 0x1e8   :  { %v224_v22 = vpop.trf.xlu0 }
 0x1e9   :  { %v243_v24 = vrot.slane %v224_v22, %v2800_v34 }
 0x1eb   :  { %v2858_v28 = vadd.f32 %v243_v24, %v2853_v23 }
 0x1ec   :  { %598 = vrot.lane.b32.xlu1 %v2772_v7, %s2706_s3 }
 0x1ed   :  { %v246_v29 = vsel %vm245_vm11, %v2858_v28, -inf }
 0x1ee   :  { %247 = vmax.xlane.f32.xlu0 %v246_v29 }
 0x1f0   :  { %731 = vrot.lane.b32.xlu1 %v2766_v5, %s2707_s11 }
 0x1f2   :  { %580 = vmax.xlane.f32.xlu0 %v579_v37 }
 0x1f6   :  { %711 = vmax.xlane.f32.xlu0 %v710_v41 }
 0x1fa   :  { %842 = vmax.xlane.f32.xlu0 %v841_v43 }
 0x210   :  { %600 = vrot.lane.b32.xlu0 %v2766_v5, %s2706_s3 }
 0x214   :  { %862 = vrot.lane.b32.xlu0 %v2766_v5, %s2709_s12 }
 0x258   :  { %v453_v45 = vpop.xlane.xlu1 %452  ;;  %v456_v46 = vpop.xlane.xlu0 %455 }
 0x259   :  { %v457_v47 = vsub.f32 %v2823_v61, %v453_v45  ;;  %v458_v48 = vsub.f32 %v2826_v62, %v456_v46 }
 0x25b   :  { %v459_v49 = vmul.f32 1.442695, %v457_v47  ;;  %v461_v50 = vmul.f32 1.442695, %v458_v48 }
 0x25c   :  { %v578_v2 = vpop.xlane.xlu1 %577 }
 0x25d   :  { %2590 = vpow2.f32 %v459_v49  ;;  %v582_v53 = vsub.f32 %v2833_v4, %v578_v2 }
 0x25e   :  { %2592 = vpow2.f32 %v461_v50 }
 0x25f   :  { %v584_v1 = vmul.f32 1.442695, %v582_v53 }
 0x260   :  { %v709_v54 = vpop.xlane.xlu1 %708 }
 0x261   :  { %2594 = vpow2.f32 %v584_v1  ;;  %v713_v55 = vsub.f32 %v2838_v10, %v709_v54 }
 0x263   :  { %v715_v56 = vmul.f32 1.442695, %v713_v55 }
 0x264   :  { %v840_v5 = vpop.xlane.xlu1 %839 }
 0x265   :  { %2596 = vpow2.f32 %v715_v56  ;;  %v844_v57 = vsub.f32 %v2843_v15, %v840_v5 }
 0x267   :  { %v846_v58 = vmul.f32 1.442695, %v844_v57 }
 0x268   :  { %v2891_v59 = vpop.permute.xlu1 %598 }
 0x269   :  { %2598 = vpow2.f32 %v846_v58 }
 0x26a   :  { %v2591_v60 = vpop.eup %2590 }
 0x26b   :  { %v2593_v61 = vpop.eup %2592  ;;  %v463_v62 = vsel %vm262_vm5, %v2591_v60, 0.0 }
 0x26c   :  { %v732_v63 = vpop.permute.xlu1 %731  ;;  %464 = vadd.xlane.f32.xlu0 %v463_v62  ;;  %v466_v0 = vsel %vm262_vm5, %v2593_v61, 0.0  ;;  %v2931_v62 = vrot.slane %v2850_v18, 6 }
 0x26d   :  { %467 = vadd.xlane.f32.xlu1 %v466_v0  ;;  %2442 = vmatprep.subr.mxu0 %v732_v63 }
 0x26e   :  { %v2895_v3 = vpop.eup %2594 }
 0x26f   :  { %v588_v4 = vsel %vm262_vm5, %v2895_v3, 0.0 }
 0x270   :  { %589 = vadd.xlane.f32.xlu0 %v588_v4 }
 0x272   :  { %v2597_v6 = vpop.eup %2596 }
 0x273   :  { %v719_v8 = vsel %vm262_vm5, %v2597_v6, 0.0 }
 0x274   :  { %720 = vadd.xlane.f32.xlu0 %v719_v8 }
 0x276   :  { %v2900_v9 = vpop.eup %2598 }
 0x277   :  { %v248_v10 = vpop.xlane.xlu0 %247  ;;  %v850_v11 = vsel %vm262_vm5, %v2900_v9, 0.0 }
 0x278   :  { %851 = vadd.xlane.f32.xlu0 %v850_v11  ;;  %v249_v20 = vsub.f32 %v2858_v28, %v248_v10 }
 0x27a   :  { %v250_v26 = vmul.f32 1.442695, %v249_v20 }
 0x27b   :  { %v581_v12 = vpop.xlane.xlu0 %580 }
 0x27c   :  { %v583_v15 = vsub.f32 %v2865_v30, %v581_v12 }
 0x27e   :  { %v586_v16 = vmul.f32 1.442695, %v583_v15 }
 0x27f   :  { %v712_v17 = vpop.xlane.xlu0 %711 }
 0x280   :  { %2600 = vpow2.f32 %v586_v16  ;;  %v714_v19 = vsub.f32 %v706_v38, %v712_v17 }
 0x282   :  { %v717_v22 = vmul.f32 1.442695, %v714_v19  ;;  %v49_v19 = vld [vmem:[%s3290_s4 + $0x20] sm:$0xff] }
 0x283   :  { %v843_v24 = vpop.xlane.xlu0 %842 }
 0x284   :  { %2602 = vpow2.f32 %v717_v22  ;;  %v845_v25 = vsub.f32 %v2874_v42, %v843_v24  ;;  %v48_v22 = vld [vmem:[%s3290_s4 + $0x18] sm:$0xff]  ;;  %v47_v24 = vld [vmem:[%s3290_s4 + $0x10] sm:$0xff] }
 0x286   :  { %v848_v27 = vmul.f32 1.442695, %v845_v25 }
 0x287   :  { %v2907_v29 = vpop.permute.xlu0 %600 }
 0x288   :  { %2604 = vpow2.f32 %v848_v27  ;;  %2435 = vmatprep.subr.mxu1 %v2907_v29 }
 0x289   :  { %2606 = vpow2.f32 %v250_v26  ;;  %v46_v26 = vld [vmem:[%s3290_s4 + $0x8] sm:$0xff] }
 0x28b   :  { %v863_v42 = vpop.permute.xlu0 %862 }
 0x28d   :  { %v2910_v30 = vpop.eup %2600 }
 0x28e   :  { %860 = vrot.lane.b32.xlu0 %v2772_v7, %s2709_s12  ;;  %v591_v28 = vsel %vm262_vm5, %v2910_v30, 0.0 }
 0x28f   :  { %592 = vadd.xlane.f32.xlu1 %v591_v28 }
 0x291   :  { %v2603_v31 = vpop.eup %2602 }
 0x292   :  { %v722_v33 = vsel %vm262_vm5, %v2603_v31, 0.0 }
 0x293   :  { %723 = vadd.xlane.f32.xlu1 %v722_v33 }
 0x295   :  { %v2917_v37 = vpop.eup %2604 }
 0x296   :  { %v853_v38 = vsel %vm262_vm5, %v2917_v37, 0.0  ;;  %v2607_v40 = vpop.eup %2606 }
 0x297   :  { %854 = vadd.xlane.f32.xlu1 %v853_v38  ;;  %v252_v41 = vsel %vm245_vm11, %v2607_v40, 0.0 }
 0x29b   :  { %253 = vadd.xlane.f32.xlu1 %v252_v41 }
 0x2ac   :  { %729 = vrot.lane.b32.xlu1 %v2772_v7, %s2707_s11 }
 0x2f5   :  { %v465_v43 = vpop.xlane.xlu0 %464 }
 0x2f6   :  { %v468_v45 = vpop.xlane.xlu1 %467  ;;  %2608 = vrcp.f32 %v465_v43 }
 0x2f7   :  { %2610 = vrcp.f32 %v468_v45 }
 0x2f9   :  { %v590_v46 = vpop.xlane.xlu0 %589 }
 0x2fd   :  { %v721_v47 = vpop.xlane.xlu0 %720 }
 0x2fe   :  { %2612 = vrcp.f32 %v721_v47 }
 0x301   :  { %v852_v5 = vpop.xlane.xlu0 %851 }
 0x303   :  { %v2609_v48 = vpop.eup %2608 }
 0x304   :  { %v2611_v49 = vpop.eup %2610  ;;  %v470_v50 = vmul.f32 %v2609_v48, %v2591_v60 }
 0x305   :  { %v472_v2 = vmul.f32 %v2611_v49, %v2593_v61 }
 0x306   :  { %2432 = vmatprep.mubr.msk.f32.mxu0 %vm262_vm5, %v470_v50 }
 0x307   :  { %2433 = vmatmul.mubr.msk.f32.vlgmr.msra.gmra.mxu0 %vm262_vm5, %v472_v2 }
 0x308   :  { %2443 = vmatpush3.msra.mxu0 %v732_v63 }
 0x30b   :  { %v2613_v7 = vpop.eup %2612 }
 0x30c   :  { %v726_v53 = vmul.f32 %v2613_v7, %v2597_v6 }
 0x30e   :  { %2446 = vmatprep.mubr.msk.f32.mxu0 %vm262_vm5, %v726_v53 }
 0x318   :  { %v593_v1 = vpop.xlane.xlu1 %592 }
 0x31c   :  { %v724_v54 = vpop.xlane.xlu1 %723 }
 0x31d   :  { %2614 = vrcp.f32 %v724_v54  ;;  %v1068_v54 = vstv %s2317_s26 }
 0x31e   :  { %2616 = vrcp.f32 %v590_v46 }
 0x320   :  { %v855_v55 = vpop.xlane.xlu1 %854 }
 0x324   :  { %v254_v56 = vpop.xlane.xlu1 %253 }
 0x325   :  { %2618 = vrcp.f32 %v254_v56 }
 0x326   :  { %2620 = vrcp.f32 %v593_v1 }
 0x327   :  { %2622 = vrcp.f32 %v852_v5 }
 0x328   :  { %v730_v57 = vpop.permute.xlu1 %729  ;;  %2624 = vrcp.f32 %v855_v55 }
 0x329   :  { %2444 = vmatprep.subr.mxu0 %v730_v57 }
 0x32a   :  { %v2615_v58 = vpop.eup %2614  ;;  %2445 = vmatpush3.msra.mxu0 %v730_v57 }
 0x32b   :  { %v728_v60 = vmul.f32 %v2615_v58, %v2603_v31  ;;  %v2617_v61 = vpop.eup %2616  ;;  %2456 = vmatprep.subr.mxu0 %v49_v19 }
 0x32c   :  { %v595_v8 = vmul.f32 %v2617_v61, %v2895_v3  ;;  %v861_v3 = vpop.permute.xlu0 %860 }
 0x32d   :  { %2447 = vmatmul.mubr.msk.f32.vlgmr.msra.gmra.mxu0 %vm262_vm5, %v728_v60 }
 0x32e   :  { %2457 = vmatpush3.msra.mxu0 %v49_v19 }
 0x32f   :  { %2458 = vmatprep.subr.mxu0 %v48_v22 }
 0x330   :  { %2459 = vmatpush3.msra.mxu0 %v48_v22 }
 0x331   :  { %2460 = vmatprep.subr.mxu0 %v47_v24 }
 0x332   :  { %v2619_v63 = vpop.eup %2618  ;;  %2461 = vmatpush3.msra.mxu0 %v47_v24 }
 0x333   :  { %v256_v0 = vmul.f32 %v2619_v63, %v2607_v40  ;;  %v2621_v4 = vpop.eup %2620  ;;  %2462 = vmatprep.subr.mxu0 %v46_v26 }
 0x334   :  { %v2623_v10 = vpop.eup %2622  ;;  %v597_v18 = vmul.f32 %v2621_v4, %v2910_v30  ;;  %2463 = vmatpush3.msra.mxu0 %v46_v26 }
 0x335   :  { %v261_v6 = vsel %vm260_vm15, %v256_v0, %v2931_v62  ;;  %v2625_v11 = vpop.eup %2624  ;;  %v857_v12 = vmul.f32 %v2623_v10, %v2900_v9 }
 0x336   :  { %2426 = vmatmul.mubr.msk.f32.vlgmr.msra.gmra.mxu1 %vm262_vm5, %v261_v6  ;;  %v859_v15 = vmul.f32 %v2625_v11, %v2917_v37  ;;  %v54_v37 = vld [vmem:[%s3290_s4 + $0x48] sm:$0xff] }
 0x337   :  { %2436 = vmatpush3.msra.mxu1 %v2907_v29  ;;  %2439 = vmatprep.mubr.msk.f32.mxu1 %vm262_vm5, %v595_v8 }
 0x338   :  { %2437 = vmatprep.subr.mxu1 %v2891_v59 }
 0x339   :  { %2438 = vmatpush3.msra.mxu1 %v2891_v59 }
 0x33a   :  { %2449 = vmatprep.subr.mxu1 %v863_v42  ;;  %2440 = vmatmul.mubr.msk.f32.vlgmr.msra.gmra.mxu1 %vm262_vm5, %v597_v18 }
 0x33b   :  { %2450 = vmatpush3.msra.mxu1 %v863_v42  ;;  %2453 = vmatprep.mubr.msk.f32.mxu1 %vm262_vm5, %v857_v12  ;;  %v981_v42 = vrot.slane %v54_v37, %v2800_v34 }
 0x33c   :  { %2451 = vmatprep.subr.mxu1 %v861_v3 }
 0x33d   :  { %2452 = vmatpush3.msra.mxu1 %v861_v3 }
 0x33e   :  { %2454 = vmatmul.mubr.msk.f32.vlgmr.msra.gmra.mxu1 %vm262_vm5, %v859_v15  ;;  %2467 = vmatprep.subr.mxu1 %v2708_v44 }
 0x33f   :  { %2471 = vmatprep.mubr.msk.f32.mxu1 %vm2710_vm14, %v2708_v44 }
 0x3c7   :  { %v2434_v59 = vpop.f32.mrf.mxu0 }
 0x3c9   :  { %v545_v9 = vpop.f32.mrf.mxu0 }
 0x3ed   :  { %v2448_v16 = vpop.f32.mrf.mxu0 }
 0x3ee   :  { %959 = vrot.lane.b32.xlu0 %v2448_v16, %s2711_s13 }
 0x3ef   :  { %v807_v17 = vpop.f32.mrf.mxu0 }
 0x3f0   :  { %957 = vrot.lane.b32.xlu1 %v807_v17, %s2711_s13 }
 0x3f6   :  { %v2955_v20 = vpop.f32.mrf.mxu1 }
 0x3f8   :  { %v2427_v25 = vpop.f32.mrf.mxu1 }
 0x3fa   :  { %v2441_v27 = vpop.f32.mrf.mxu1 }
 0x3fb   :  { %951 = vrot.lane.b32.xlu0 %v2441_v27, %s2712_s22 }
 0x3fc   :  { %v676_v29 = vpop.f32.mrf.mxu1 }
 0x3fd   :  { %949 = vrot.lane.b32.xlu1 %v676_v29, %s2712_s22 }
 0x3fe   :  { %v2455_v30 = vpop.f32.mrf.mxu1 }
 0x3ff   :  { %967 = vrot.lane.b32.xlu0 %v2455_v30, %s2713_s23 }
 0x400   :  { %v938_v28 = vpop.f32.mrf.mxu1 }
 0x401   :  { %965 = vrot.lane.b32.xlu1 %v938_v28, %s2713_s23 }
 0x460   :  { %v960_v31 = vpop.permute.xlu0 %959 }
 0x462   :  { %v958_v33 = vpop.permute.xlu1 %957 }
 0x46d   :  { %v952_v38 = vpop.permute.xlu0 %951 }
 0x46e   :  { %v972_v40 = vsel %vm103_vm0, %v2434_v59, %v952_v38 }
 0x46f   :  { %v950_v41 = vpop.permute.xlu1 %949  ;;  %v974_v45 = vsel %vm262_vm5, %v972_v40, %v960_v31 }
 0x470   :  { %v971_v43 = vsel %vm103_vm0, %v545_v9, %v950_v41 }
 0x471   :  { %v968_v46 = vpop.permute.xlu0 %967  ;;  %v973_v49 = vsel %vm262_vm5, %v971_v43, %v958_v33 }
 0x472   :  { %v977_v47 = vsel %vm975_vm1, %v974_v45, %v968_v46 }
 0x473   :  { %v983_v48 = vadd.f32 %v981_v42, %v977_v47  ;;  %v966_v50 = vpop.permute.xlu1 %965 }
 0x474   :  { %v976_v2 = vsel %vm975_vm1, %v973_v49, %v966_v50 }
 0x475   :  { %v2980_v7 = vmax.f32 %v983_v48, 0.0  ;;  %v982_v53 = vadd.f32 %v981_v42, %v976_v2 }
 0x477   :  { %v2982_v1 = vmax.f32 %v982_v53, 0.0  ;;  %2468 = vmatpush3.msra.mxu1 %v2980_v7 }
 0x478   :  { %2469 = vmatprep.subr.mxu1 %v2708_v44 }
 0x479   :  { %2464 = vmatprep.mubr.msk.f32.mxu0 %vm986_vm2, %v2982_v1  ;;  %2470 = vmatpush3.msra.mxu1 %v2982_v1 }
 0x47a   :  { %2465 = vmatmul.mubr.msk.f32.vlgmr.msra.gmra.mxu0 %vm986_vm2, %v2980_v7  ;;  %2474 = vmatprep.subr.mxu1 %v2708_v44 }
 0x53a   :  { %v2992_v55 = vpop.f32.mrf.mxu0 }
 0x53b   :  { %v1070_v56 = vadd.f32 %v2992_v55, %v1068_v54  ;;  %2485 = vmatprep.subr.mxu0 %v2992_v55 }
 0x53c   :  { %v2996_v5 = vpop.f32.mrf.mxu0  ;;  %2486 = vmatpush3.msra.mxu0 %v2992_v55 }
 0x53d   :  { %v1069_v57 = vadd.f32 %v1068_v54, %v2996_v5  ;;  %2487 = vmatprep.subr.mxu0 %v2996_v5  ;;  %v1072_v58 = vsub.f32 0.0, %v1070_v56 }
 0x53e   :  { %2488 = vmatpush3.msra.mxu0 %v2996_v5 }
 0x53f   :  { %v1075_v60 = vmul.f32 1.442695, %v1072_v58  ;;  %v1071_v61 = vsub.f32 0.0, %v1069_v57 }
 0x541   :  { %2626 = vpow2.f32 %v1075_v60  ;;  %v1073_v63 = vmul.f32 1.442695, %v1071_v61 }
 0x543   :  { %2628 = vpow2.f32 %v1073_v63 }
 0x54e   :  { %v2627_v0 = vpop.eup %2626 }
 0x54f   :  { %v1078_v4 = vadd.f32 1.0, %v2627_v0 }
 0x550   :  { %v2629_v6 = vpop.eup %2628 }
 0x551   :  { %2630 = vrcp.f32 %v1078_v4  ;;  %v1077_v8 = vadd.f32 1.0, %v2629_v6 }
 0x553   :  { %2632 = vrcp.f32 %v1077_v8 }
 0x55e   :  { %v2631_v10 = vpop.eup %2630 }
 0x55f   :  { %1087 = vrot.lane.b32.xlu0 %v2631_v10, %s2703_s30 }
 0x560   :  { %v2633_v18 = vpop.eup %2632 }
 0x561   :  { %1085 = vrot.lane.b32.xlu1 %v2633_v18, %s2703_s30 }
 0x563   :  { %1319 = vrot.lane.b32.xlu0 %v2996_v5, %s2700_s29 }
 0x567   :  { %1358 = vperm.xlu0 %2572, %v2996_v5  }
 0x56b   :  { %1362 = vperm.xlu0 %2572, %v2992_v55  }
 0x56f   :  { %2573 = vset.pattern.permute.xlu0 %v2701_v13 }
 0x5d1   :  { %v1088_v12 = vpop.permute.xlu0 %1087 }
 0x5d3   :  { %v1086_v11 = vpop.permute.xlu1 %1085 }
 0x5d4   :  { %1091 = vxpose.xlu1.b32.start [1/2] (short) (narrow) %v1086_v11, 8 }
 0x5d8   :  { %1092 = vxpose.xlu1.b32.end [2/2] (short) (narrow) %v1088_v12, 8 }
 0x5f6   :  { %1321 = vrot.lane.b32.xlu1 %v2992_v55, %s2700_s29 }
 0x5f7   :  { %2574 = vset.pattern.permute.xlu1 %v2701_v13  ;;  %v1320_v13 = vpop.permute.xlu0 %1319 }
 0x5fa   :  { %1487 = vperm.xlu1 %2574, %v2992_v55  }
 0x5fb   :  { %v1359_v16 = vpop.permute.xlu0 %1358 }
 0x5fe   :  { %2575 = vset.pattern.permute.xlu1 %v2702_v14 }
 0x5ff   :  { %1614 = vperm.xlu1 %2575, %v2996_v5   ;;  %v1363_v17 = vpop.permute.xlu0 %1362 }
 0x603   :  { %2577 = vset.pattern.permute.xlu1 %v2704_v21 }
 0x604   :  { %1745 = vperm.xlu1 %2577, %v2996_v5  }
 0x608   :  { %1749 = vperm.xlu1 %2577, %v2992_v55  }
 0x650   :  { %v1107_v3 = vpop.trf.xlu1 }
 0x651   :  { %v1126_v15 = vrot.slane %v1107_v3, %v2800_v34 }
 0x653   :  { %v1127_v59 = vadd.f32 %v1126_v15, %v2853_v23 }
 0x655   :  { %v1128_v9 = vsel %vm245_vm11, %v1127_v59, -inf }
 0x656   :  { %1129 = vmax.xlane.f32.xlu0 %v1128_v9 }
 0x668   :  { %v1322_v27 = vpop.permute.xlu1 %1321 }
 0x66c   :  { %1483 = vperm.xlu0 %2573, %v2996_v5  }
 0x670   :  { %2576 = vset.pattern.permute.xlu0 %v2702_v14 }
 0x671   :  { %1618 = vperm.xlu0 %2576, %v2992_v55  }
 0x675   :  { %v1488_v37 = vpop.permute.xlu1 %1487 }
 0x67a   :  { %v1615_v50 = vpop.permute.xlu1 %1614 }
 0x67f   :  { %v1746_v10 = vpop.permute.xlu1 %1745 }
 0x6df   :  { %v1130_v19 = vpop.xlane.xlu0 %1129 }
 0x6e0   :  { %v1131_v22 = vsub.f32 %v1127_v59, %v1130_v19  ;;  %v1750_v59 = vpop.permute.xlu1 %1749 }
 0x6e2   :  { %v1132_v24 = vmul.f32 1.442695, %v1131_v22 }
 0x6e4   :  { %2634 = vpow2.f32 %v1132_v24 }
 0x6e7   :  { %v1484_v29 = vpop.permute.xlu0 %1483 }
 0x6ec   :  { %v1619_v30 = vpop.permute.xlu0 %1618 }
 0x6f1   :  { %v2635_v25 = vpop.eup %2634 }
 0x6f2   :  { %v1134_v26 = vsel %vm245_vm11, %v2635_v25, 0.0 }
 0x6f3   :  { %1135 = vadd.xlane.f32.xlu0 %v1134_v26 }
 0x720   :  { %1325 = vxpose.xlu0.b32.start [1/2] (short) (narrow) %v1320_v13, 8 }
 0x724   :  { %1326 = vxpose.xlu0.b32.end [2/2] (short) (narrow) %v1322_v27, 8 }
 0x77c   :  { %v1136_v28 = vpop.xlane.xlu0 %1135 }
 0x77d   :  { %2636 = vrcp.f32 %v1136_v28 }
 0x78a   :  { %v2637_v14 = vpop.eup %2636 }
 0x78b   :  { %v1138_v31 = vmul.f32 %v2637_v14, %v2635_v25  ;;  %v2714_v14 = vmov 0  }
 0x78c   :  { %2578 = vset.pattern.permute.xlu0 %v2714_v14 }
 0x78d   :  { %v1139_v33 = vsel %vm260_vm15, %v1138_v31, %v2931_v62 }
 0x78e   :  { %2472 = vmatmul.mubr.msk.f32.vlgmr.msra.gmra.mxu1 %vm262_vm5, %v1139_v33 }
 0x78f   :  { %2482 = vmatprep.mubr.msk.f32.mxu1 %vm2710_vm14, %v2708_v44 }
 0x79c   :  { %v1341_v38 = vpop.trf.xlu0 }
 0x79d   :  { %v1368_v40 = vrot.slane %v1341_v38, %v2800_v34  ;;  %v1493_v41 = vrot.slane %v1341_v38, %v564_v35  ;;  %v1624_v42 = vrot.slane %v1341_v38, %v695_v36  ;;  %v1755_v4 = vrot.slane %v1341_v38, %v826_v39 }
 0x79f   :  { %v1369_v43 = vadd.f32 %v1368_v40, %v1359_v16  ;;  %v1370_v45 = vadd.f32 %v1368_v40, %v1363_v17  ;;  %v1494_v46 = vadd.f32 %v1493_v41, %v1484_v29  ;;  %v1495_v47 = vadd.f32 %v1493_v41, %v1488_v37 }
 0x7a0   :  { %v1625_v53 = vadd.f32 %v1624_v42, %v1615_v50  ;;  %v1626_v0 = vadd.f32 %v1624_v42, %v1619_v30  ;;  %v1756_v12 = vadd.f32 %v1755_v4, %v1746_v10  ;;  %v1757_v9 = vadd.f32 %v1755_v4, %v1750_v59  ;;  %v60_v10 = vld [vmem:[%s3290_s4 + $0x78] sm:$0xff] }
 0x7a1   :  { %vm1372_vm3 = vcmp.ge.f32.partialorder %v1370_v45, 0.0  ;;  %v1374_v48 = vmul.f32 0.2, %v1370_v45  ;;  %vm1371_vm4 = vcmp.ge.f32.partialorder %v1369_v43, 0.0  ;;  %v1373_v49 = vmul.f32 0.2, %v1369_v43  ;;  %2475 = vmatpush3.msra.mxu1 %v60_v10 }
 0x7a2   :  { %vm1496_vm6 = vcmp.ge.f32.partialorder %v1494_v46, 0.0  ;;  %v1498_v2 = vmul.f32 0.2, %v1494_v46  ;;  %v1499_v57 = vmul.f32 0.2, %v1495_v47  ;;  %vm1497_vm7 = vcmp.ge.f32.partialorder %v1495_v47, 0.0  ;;  %2476 = vmatprep.subr.mxu1 %v2708_v44 }
 0x7a3   :  { %v1376_v54 = vsel %vm1372_vm3, %v1370_v45, %v1374_v48  ;;  %v1375_v56 = vsel %vm1371_vm4, %v1369_v43, %v1373_v49  ;;  %v1629_v8 = vmul.f32 0.2, %v1625_v53  ;;  %vm1627_vm8 = vcmp.ge.f32.partialorder %v1625_v53, 0.0 }
 0x7a4   :  { %v1378_v35 = vadd.f32 %v1376_v54, %v2820_v52  ;;  %v1377_v58 = vadd.f32 %v1375_v56, %v2818_v51  ;;  %v1500_v36 = vsel %vm1496_vm6, %v1494_v46, %v1498_v2  ;;  %v1501_v6 = vsel %vm1497_vm7, %v1495_v47, %v1499_v57 }
 0x7a5   :  { %v1502_v63 = vadd.f32 %v1500_v36, %v2818_v51  ;;  %v3044_v11 = vadd.f32 %v1501_v6, %v2820_v52  ;;  %v1631_v3 = vsel %vm1627_vm8, %v1625_v53, %v1629_v8  ;;  %v1630_v15 = vmul.f32 0.2, %v1626_v0 }
 0x7a6   :  { %v1382_v60 = vsel %vm262_vm5, %v1378_v35, -inf  ;;  %v1379_v61 = vsel %vm262_vm5, %v1377_v58, -inf  ;;  %vm1628_vm9 = vcmp.ge.f32.partialorder %v1626_v0, 0.0  ;;  %v3049_v39 = vadd.f32 %v1631_v3, %v2818_v51 }
 0x7a7   :  { %1383 = vmax.xlane.f32.xlu0 %v1382_v60  ;;  %1380 = vmax.xlane.f32.xlu1 %v1379_v61  ;;  %v1504_v18 = vsel %vm262_vm5, %v1502_v63, -inf  ;;  %v1507_v32 = vsel %vm262_vm5, %v3044_v11, -inf  ;;  %v1632_v13 = vsel %vm1628_vm9, %v1626_v0, %v1630_v15  ;;  %v1760_v16 = vmul.f32 0.2, %v1756_v12  ;;  %v57_v15 = vld [vmem:[%s3290_s4 + $0x60] sm:$0xff] }
 0x7a8   :  { %vm1758_vm10 = vcmp.ge.f32.partialorder %v1756_v12, 0.0  ;;  %v1635_v17 = vsel %vm262_vm5, %v3049_v39, -inf  ;;  %v3054_v19 = vadd.f32 %v1632_v13, %v2820_v52  ;;  %v1761_v24 = vmul.f32 0.2, %v1757_v9 }
 0x7a9   :  { %v1762_v22 = vsel %vm1758_vm10, %v1756_v12, %v1760_v16  ;;  %vm1759_vm12 = vcmp.ge.f32.partialorder %v1757_v9, 0.0  ;;  %v2715_v60 = vmov 1  }
 0x7aa   :  { %v1638_v25 = vsel %vm262_vm5, %v3054_v19, -inf  ;;  %v3059_v26 = vadd.f32 %v1762_v22, %v2818_v51  ;;  %v1763_v27 = vsel %vm1759_vm12, %v1757_v9, %v1761_v24 }
 0x7ab   :  { %1505 = vmax.xlane.f32.xlu1 %v1504_v18  ;;  %v1765_v30 = vadd.f32 %v1763_v27, %v2820_v52  ;;  %v59_v18 = vld [vmem:[%s3290_s4 + $0x70] sm:$0xff] }
 0x7ac   :  { %v1766_v29 = vsel %vm262_vm5, %v3059_v26, -inf  ;;  %2477 = vmatpush3.msra.mxu1 %v59_v18 }
 0x7ad   :  { %v1769_v28 = vsel %vm262_vm5, %v1765_v30, -inf  ;;  %2478 = vmatprep.subr.mxu1 %v2708_v44 }
 0x7af   :  { %1508 = vmax.xlane.f32.xlu1 %v1507_v32 }
 0x7b3   :  { %1636 = vmax.xlane.f32.xlu1 %v1635_v17 }
 0x7b7   :  { %1639 = vmax.xlane.f32.xlu1 %v1638_v25 }
 0x7bb   :  { %1767 = vmax.xlane.f32.xlu1 %v1766_v29 }
 0x7bf   :  { %1770 = vmax.xlane.f32.xlu1 %v1769_v28 }
 0x7f2   :  { %71 = vxpose.xlu1.b32.start.end [1/1] (short) (narrow) %v2853_v23, 16 }
 0x810   :  { %2579 = vset.pattern.permute.xlu1 %v2714_v14 }
 0x830   :  { %v1384_v31 = vpop.xlane.xlu0 %1383  ;;  %v1381_v33 = vpop.xlane.xlu1 %1380 }
 0x831   :  { %v1386_v51 = vsub.f32 %v1378_v35, %v1384_v31  ;;  %v1385_v37 = vsub.f32 %v1377_v58, %v1381_v33 }
 0x833   :  { %v1387_v38 = vmul.f32 1.442695, %v1385_v37  ;;  %v1389_v40 = vmul.f32 1.442695, %v1386_v51 }
 0x834   :  { %v1506_v41 = vpop.xlane.xlu1 %1505 }
 0x835   :  { %v1510_v42 = vsub.f32 %v1502_v63, %v1506_v41  ;;  %2638 = vpow2.f32 %v1387_v38 }
 0x836   :  { %2640 = vpow2.f32 %v1389_v40 }
 0x837   :  { %v1512_v52 = vmul.f32 1.442695, %v1510_v42 }
 0x838   :  { %v1509_v53 = vpop.xlane.xlu1 %1508 }
 0x839   :  { %2642 = vpow2.f32 %v1512_v52  ;;  %v1511_v61 = vsub.f32 %v3044_v11, %v1509_v53  ;;  %v58_v11 = vld [vmem:[%s3290_s4 + $0x68] sm:$0xff] }
 0x83a   :  { %2479 = vmatpush3.msra.mxu1 %v58_v11 }
 0x83b   :  { %v1514_v0 = vmul.f32 1.442695, %v1511_v61  ;;  %2480 = vmatprep.subr.mxu1 %v2708_v44 }
 0x83c   :  { %v1637_v54 = vpop.xlane.xlu1 %1636  ;;  %2481 = vmatpush3.msra.mxu1 %v57_v15 }
 0x83d   :  { %v1641_v63 = vsub.f32 %v3049_v39, %v1637_v54  ;;  %2644 = vpow2.f32 %v1514_v0  ;;  %v3162_v0 = vstv %s33_s2 }
 0x83f   :  { %v1643_v6 = vmul.f32 1.442695, %v1641_v63 }
 0x840   :  { %v1640_v56 = vpop.xlane.xlu1 %1639 }
 0x841   :  { %v1642_v4 = vsub.f32 %v3054_v19, %v1640_v56  ;;  %2646 = vpow2.f32 %v1643_v6 }
 0x842   :  { %v3066_v43 = vpop.eup %2638 }
 0x843   :  { %v1391_v45 = vsel %vm262_vm5, %v3066_v43, 0.0  ;;  %v3070_v46 = vpop.eup %2640 }
 0x844   :  { %1392 = vadd.xlane.f32.xlu0 %v1391_v45  ;;  %v1394_v47 = vsel %vm262_vm5, %v3070_v46, 0.0  ;;  %v1768_v57 = vpop.xlane.xlu1 %1767 }
 0x845   :  { %v1772_v12 = vsub.f32 %v3059_v26, %v1768_v57 }
 0x846   :  { %v3074_v48 = vpop.eup %2642 }
 0x847   :  { %v1516_v49 = vsel %vm262_vm5, %v3074_v48, 0.0  ;;  %v1774_v59 = vmul.f32 1.442695, %v1772_v12 }
 0x848   :  { %1395 = vadd.xlane.f32.xlu0 %v1394_v47  ;;  %v1771_v35 = vpop.xlane.xlu1 %1770 }
 0x849   :  { %v1773_v8 = vsub.f32 %v1765_v30, %v1771_v35 }
 0x84a   :  { %v3100_v32 = vpop.eup %2644 }
 0x84b   :  { %v1776_v3 = vmul.f32 1.442695, %v1773_v8  ;;  %v1519_v13 = vsel %vm262_vm5, %v3100_v32, 0.0  ;;  %v3164_v8 = vstv %s2315_s10 }
 0x84c   :  { %1517 = vadd.xlane.f32.xlu0 %v1516_v49 }
 0x84e   :  { %v3078_v50 = vpop.f32.mrf.mxu1  ;;  %v3102_v39 = vpop.eup %2646 }
 0x84f   :  { %v1647_v16 = vsel %vm262_vm5, %v3102_v39, 0.0  ;;  %v1236_v10 = vmul.f32 %v3078_v50, %v3162_v0 }
 0x850   :  { %v2473_v2 = vpop.f32.mrf.mxu1 }
 0x86e   :  { %v87_v58 = vpop.trf.xlu1 }
 0x86f   :  { %338 = vperm.xlu0 %2578, %v87_v58  }
 0x872   :  { %v88_v36 = vpop.trf.xlu1 }
 0x873   :  { %2580 = vset.pattern.permute.xlu0 %v2715_v60  ;;  %343 = vperm.xlu1 %2579, %v88_v36  }
 0x874   :  { %358 = vperm.xlu0 %2580, %v87_v58  }
 0x878   :  { %362 = vperm.xlu0 %2580, %v88_v36  }
 0x87c   :  { %2581 = vset.pattern.permute.xlu0 %v2704_v21  ;;  %v1645_v21 = vmul.f32 1.442695, %v1642_v4 }
 0x87e   :  { %2648 = vpow2.f32 %v1645_v21 }
 0x87f   :  { %2650 = vpow2.f32 %v1776_v3 }
 0x880   :  { %2652 = vpow2.f32 %v1774_v59 }
 0x88b   :  { %v3104_v9 = vpop.eup %2648 }
 0x88c   :  { %v3110_v17 = vpop.eup %2650  ;;  %v1650_v19 = vsel %vm262_vm5, %v3104_v9, 0.0 }
 0x88d   :  { %v1781_v22 = vsel %vm262_vm5, %v3110_v17, 0.0  ;;  %v3116_v24 = vpop.eup %2652 }
 0x88e   :  { %v1778_v25 = vsel %vm262_vm5, %v3116_v24, 0.0 }
 0x897   :  { %1520 = vadd.xlane.f32.xlu0 %v1519_v13  ;;  %1648 = vadd.xlane.f32.xlu1 %v1647_v16 }
 0x89b   :  { %1651 = vadd.xlane.f32.xlu0 %v1650_v19  ;;  %1782 = vadd.xlane.f32.xlu1 %v1781_v22 }
 0x89f   :  { %1779 = vadd.xlane.f32.xlu0 %v1778_v25 }
 0x8ac   :  { %1526 = vrot.lane.b32.xlu1 %v2996_v5, %s2706_s3 }
 0x8b0   :  { %1659 = vrot.lane.b32.xlu1 %v2992_v55, %s2707_s11 }
 0x8b4   :  { %1657 = vrot.lane.b32.xlu1 %v2996_v5, %s2707_s11 }
 0x8b5   :  { %1528 = vrot.lane.b32.xlu0 %v2992_v55, %s2706_s3 }
 0x8b9   :  { %1790 = vrot.lane.b32.xlu0 %v2992_v55, %s2709_s12 }
 0x8bd   :  { %1788 = vrot.lane.b32.xlu0 %v2996_v5, %s2709_s12 }
 0x8cd   :  { %v1393_v26 = vpop.xlane.xlu0 %1392 }
 0x8ce   :  { %2654 = vrcp.f32 %v1393_v26 }
 0x8d1   :  { %v1396_v27 = vpop.xlane.xlu0 %1395 }
 0x8d2   :  { %2656 = vrcp.f32 %v1396_v27 }
 0x8d5   :  { %v1518_v29 = vpop.xlane.xlu0 %1517 }
 0x8d6   :  { %2658 = vrcp.f32 %v1518_v29 }
 0x8db   :  { %v2655_v30 = vpop.eup %2654 }
 0x8dc   :  { %v1398_v28 = vmul.f32 %v2655_v30, %v3066_v43 }
 0x8de   :  { %2489 = vmatprep.mubr.msk.f32.mxu0 %vm262_vm5, %v1398_v28 }
 0x8df   :  { %v2657_v14 = vpop.eup %2656 }
 0x8e0   :  { %v1400_v31 = vmul.f32 %v2657_v14, %v3070_v46 }
 0x8e2   :  { %2490 = vmatmul.mubr.msk.f32.vlgmr.msra.gmra.mxu0 %vm262_vm5, %v1400_v31 }
 0x8e3   :  { %v2659_v55 = vpop.eup %2658 }
 0x8e4   :  { %v1523_v33 = vmul.f32 %v2659_v55, %v3074_v48 }
 0x8e6   :  { %2496 = vmatprep.mubr.msk.f32.mxu0 %vm262_vm5, %v1523_v33 }
 0x8ea   :  { %v3138_v5 = vpop.permute.xlu0 %338 }
 0x8eb   :  { %v1213_v51 = vadd.f32 %v2982_v1, %v3138_v5 }
 0x8ed   :  { %v1215_v41 = vsel %vm986_vm2, %v1213_v51, -inf }
 0x8ee   :  { %v3142_v37 = vpop.permute.xlu1 %343 }
 0x8ef   :  { %v1214_v38 = vadd.f32 %v2980_v7, %v3142_v37  ;;  %v3146_v40 = vpop.permute.xlu0 %358 }
 0x8f0   :  { %v1224_v43 = vadd.f32 %v2982_v1, %v3146_v40  ;;  %v3158_v1 = vstv %s2314_s9 }
 0x8f1   :  { %v1216_v42 = vsel %vm986_vm2, %v1214_v38, -inf  ;;  %v1237_v36 = vmul.f32 %v3078_v50, %v3158_v1 }
 0x8f2   :  { %v1217_v52 = vmax.f32 %v1215_v41, %v1216_v42  ;;  %v1226_v49 = vsel %vm986_vm2, %v1224_v43, -inf  ;;  %v53_v42 = vld [vmem:[%s3290_s4 + $0x40] sm:$0xff]  ;;  %v52_v43 = vld [vmem:[%s3290_s4 + $0x38] sm:$0xff] }
 0x8f3   :  { %v3152_v45 = vpop.permute.xlu0 %362  ;;  %v1239_v63 = vrot.slane %v1237_v36, 2 }
 0x8f4   :  { %v1218_v46 = vrot.slane %v1217_v52, 4  ;;  %v1225_v47 = vadd.f32 %v2980_v7, %v3152_v45 }
 0x8f5   :  { %v1241_v21 = vadd.f32 %v1239_v63, %v1236_v10 }
 0x8f6   :  { %v1219_v48 = vmax.f32 %v1217_v52, %v1218_v46  ;;  %v1227_v2 = vsel %vm986_vm2, %v1225_v47, -inf  ;;  %v51_v47 = vld [vmem:[%s3290_s4 + $0x30] sm:$0xff] }
 0x8f7   :  { %v1228_v53 = vmax.f32 %v1226_v49, %v1227_v2  ;;  %v50_v49 = vld [vmem:[%s3290_s4 + $0x28] sm:$0xff] }
 0x8f8   :  { %v1220_v54 = vrot.slane %v1219_v48, 2 }
 0x8f9   :  { %v1229_v56 = vrot.slane %v1228_v53, 4 }
 0x8fa   :  { %v1221_v57 = vmax.f32 %v1219_v48, %v1220_v54  ;;  %v2682_v54 = vld [vmem:[%s3287_s1 + $0x8] sm:$0xff] }
 0x8fb   :  { %v1230_v35 = vmax.f32 %v1228_v53, %v1229_v56  ;;  %v366_v56 = vadd.f32 %v2682_v54, %v3152_v45 }
 0x8fc   :  { %v1222_v7 = vrot.slane %v1221_v57, 1 }
 0x8fd   :  { %v1231_v58 = vrot.slane %v1230_v35, 2 }
 0x8fe   :  { %v1223_v4 = vmax.f32 %v1221_v57, %v1222_v7  ;;  %v347_v57 = vadd.f32 %v2682_v54, %v3142_v37  ;;  %v368_v7 = vsel %vm103_vm0, %v366_v56, -inf }
 0x8ff   :  { %v1232_v60 = vmax.f32 %v1230_v35, %v1231_v58  ;;  %v2683_v35 = vld [vmem:[%s3287_s1] sm:$0xff] }
 0x900   :  { %v365_v58 = vadd.f32 %v2683_v35, %v3146_v40  ;;  %v346_v36 = vadd.f32 %v2683_v35, %v3138_v5 }
 0x901   :  { %v1233_v61 = vrot.slane %v1232_v60, 1 }
 0x903   :  { %v1234_v6 = vmax.f32 %v1232_v60, %v1233_v61  ;;  %v349_v60 = vsel %vm103_vm0, %v347_v57, -inf  ;;  %v367_v61 = vsel %vm103_vm0, %v365_v58, -inf }
 0x904   :  { %v369_v63 = vmax.f32 %v367_v61, %v368_v7 }
 0x905   :  { %v1235_v18 = vsel %vm376_vm13, %v1223_v4, %v1234_v6  ;;  %v348_v4 = vsel %vm103_vm0, %v346_v36, -inf }
 0x906   :  { %v1242_v11 = vmul.f32 %v1235_v18, %v3164_v8  ;;  %v350_v6 = vmax.f32 %v348_v4, %v349_v60  ;;  %v370_v10 = vrot.slane %v369_v63, 4 }
 0x908   :  { %v1243_v12 = vadd.f32 %v1242_v11, %v1241_v21  ;;  %v351_v18 = vrot.slane %v350_v6, 4  ;;  %v371_v21 = vmax.f32 %v369_v63, %v370_v10 }
 0x90a   :  { %2483 = vmatmul.mubr.msk.f32.vlgmr.msra.gmra.mxu1 %vm986_vm2, %v1243_v12  ;;  %v352_v11 = vmax.f32 %v350_v6, %v351_v18  ;;  %v372_v12 = vrot.slane %v371_v21, 2 }
 0x920   :  { %v1521_v3 = vpop.xlane.xlu0 %1520  ;;  %v1649_v15 = vpop.xlane.xlu1 %1648 }
 0x921   :  { %2660 = vrcp.f32 %v1521_v3  ;;  %v353_v3 = vrot.slane %v352_v11, 2 }
 0x922   :  { %2662 = vrcp.f32 %v1649_v15  ;;  %v373_v15 = vmax.f32 %v371_v21, %v372_v12 }
 0x924   :  { %v1652_v59 = vpop.xlane.xlu0 %1651  ;;  %v1783_v13 = vpop.xlane.xlu1 %1782 }
 0x925   :  { %2664 = vrcp.f32 %v1652_v59 }
 0x926   :  { %2666 = vrcp.f32 %v1783_v13  ;;  %v354_v13 = vmax.f32 %v352_v11, %v353_v3  ;;  %v1911_v11 = vstv %s2318_s25 }
 0x928   :  { %v1780_v16 = vpop.xlane.xlu0 %1779  ;;  %v1527_v19 = vpop.permute.xlu1 %1526 }
 0x929   :  { %2668 = vrcp.f32 %v1780_v16 }
 0x92c   :  { %v1529_v50 = vpop.permute.xlu0 %1528  ;;  %v1660_v22 = vpop.permute.xlu1 %1659 }
 0x92d   :  { %2492 = vmatprep.subr.mxu0 %v1529_v50  ;;  %2499 = vmatprep.subr.mxu1 %v1660_v22 }
 0x92e   :  { %v2661_v25 = vpop.eup %2660  ;;  %2493 = vmatpush3.msra.mxu0 %v1529_v50  ;;  %2500 = vmatpush3.msra.mxu1 %v1660_v22  ;;  %v55_v22 = vld [vmem:[%s3290_s4 + $0x50] sm:$0xff] }
 0x92f   :  { %v2663_v26 = vpop.eup %2662  ;;  %2494 = vmatprep.subr.mxu0 %v1527_v19  ;;  %v1525_v27 = vmul.f32 %v2661_v25, %v3100_v32  ;;  %v355_v25 = vrot.slane %v354_v13, 1 }
 0x930   :  { %v1791_v29 = vpop.permute.xlu0 %1790  ;;  %2495 = vmatpush3.msra.mxu0 %v1527_v19  ;;  %v1658_v30 = vpop.permute.xlu1 %1657  ;;  %v1654_v28 = vmul.f32 %v2663_v26, %v3102_v39  ;;  %v374_v19 = vrot.slane %v373_v15, 1 }
 0x931   :  { %2497 = vmatmul.mubr.msk.f32.vlgmr.msra.gmra.mxu0 %vm262_vm5, %v1525_v27  ;;  %2501 = vmatprep.subr.mxu1 %v1658_v30 }
 0x932   :  { %v2665_v14 = vpop.eup %2664  ;;  %2503 = vmatprep.mubr.msk.f32.mxu1 %vm262_vm5, %v1654_v28  ;;  %2506 = vmatprep.subr.mxu0 %v1791_v29  ;;  %v375_v27 = vmax.f32 %v373_v15, %v374_v19 }
 0x933   :  { %2502 = vmatpush3.msra.mxu1 %v1658_v30  ;;  %2507 = vmatpush3.msra.mxu0 %v1791_v29  ;;  %v1656_v31 = vmul.f32 %v2665_v14, %v3104_v9  ;;  %v2667_v33 = vpop.eup %2666  ;;  %v1908_v29 = vrot.slane %v55_v22, %v2800_v34  ;;  %v381_v30 = vmul.f32 %v3158_v1, %v2955_v20 }
 0x934   :  { %v1789_v55 = vpop.permute.xlu0 %1788  ;;  %v1787_v51 = vmul.f32 %v2667_v33, %v3110_v17  ;;  %2513 = vmatprep.subr.mxu1 %v53_v42  ;;  %v356_v14 = vmax.f32 %v354_v13, %v355_v25 }
 0x935   :  { %2504 = vmatmul.mubr.msk.f32.vlgmr.msra.gmra.mxu1 %vm262_vm5, %v1656_v31  ;;  %2508 = vmatprep.subr.mxu0 %v1789_v55 }
 0x936   :  { %v2669_v32 = vpop.eup %2668  ;;  %2509 = vmatpush3.msra.mxu0 %v1789_v55  ;;  %2514 = vmatpush3.msra.mxu1 %v53_v42  ;;  %v377_v42 = vsel %vm376_vm13, %v356_v14, %v375_v27 }
 0x937   :  { %v1785_v39 = vmul.f32 %v2669_v32, %v3116_v24  ;;  %2524 = vmatprep.subr.mxu0 %v2708_v44  ;;  %2515 = vmatprep.subr.mxu1 %v52_v43 }
 0x938   :  { %2516 = vmatpush3.msra.mxu1 %v52_v43 }
 0x939   :  { %2510 = vmatprep.mubr.msk.f32.mxu0 %vm262_vm5, %v1785_v39  ;;  %2517 = vmatprep.subr.mxu1 %v51_v47 }
 0x93a   :  { %2511 = vmatmul.mubr.msk.f32.vlgmr.msra.gmra.mxu0 %vm262_vm5, %v1787_v51  ;;  %2518 = vmatpush3.msra.mxu1 %v51_v47  ;;  %v56_v47 = vld [vmem:[%s3290_s4 + $0x58] sm:$0xff] }
 0x93b   :  { %2528 = vmatprep.mubr.msk.f32.mxu0 %vm2710_vm14, %v2708_v44  ;;  %2519 = vmatprep.subr.mxu1 %v50_v49 }
 0x93c   :  { %2520 = vmatpush3.msra.mxu1 %v50_v49 }
 0x93d   :  { %2542 = vmatprep.subr.mxu1 %v2708_v44 }
 0x9a2   :  { %v2491_v41 = vpop.f32.mrf.mxu0 }
 0x9a4   :  { %v1473_v24 = vpop.f32.mrf.mxu0 }
 0x9ca   :  { %v3184_v9 = vpop.f32.mrf.mxu1 }
 0x9cc   :  { %v2484_v38 = vpop.f32.mrf.mxu1 }
 0x9f1   :  { %v2498_v52 = vpop.f32.mrf.mxu0 }
 0x9f2   :  { %1879 = vrot.lane.b32.xlu0 %v2498_v52, %s2712_s22  ;;  %v383_v52 = vrot.slane %v381_v30, 2 }
 0x9f3   :  { %v1604_v17 = vpop.f32.mrf.mxu0 }
 0x9f4   :  { %1877 = vrot.lane.b32.xlu1 %v1604_v17, %s2712_s22 }
 0x9f5   :  { %v2505_v46 = vpop.f32.mrf.mxu1 }
 0x9f6   :  { %1887 = vrot.lane.b32.xlu0 %v2505_v46, %s2711_s13 }
 0x9f7   :  { %v1735_v48 = vpop.f32.mrf.mxu1 }
 0x9f8   :  { %1885 = vrot.lane.b32.xlu1 %v1735_v48, %s2711_s13  ;;  %v387_v48 = vmul.f32 %v3164_v8, %v377_v42 }
 0x9fa   :  { %v2512_v2 = vpop.f32.mrf.mxu0 }
 0x9fb   :  { %1895 = vrot.lane.b32.xlu0 %v2512_v2, %s2713_s23 }
 0x9fc   :  { %v1866_v53 = vpop.f32.mrf.mxu0 }
 0x9fd   :  { %1893 = vrot.lane.b32.xlu1 %v1866_v53, %s2713_s23 }
 0xa64   :  { %v1880_v59 = vpop.permute.xlu0 %1879 }
 0xa65   :  { %v1900_v28 = vsel %vm103_vm0, %v2491_v41, %v1880_v59 }
 0xa66   :  { %v1878_v16 = vpop.permute.xlu1 %1877 }
 0xa67   :  { %v1899_v33 = vsel %vm103_vm0, %v1473_v24, %v1878_v16  ;;  %v379_v24 = vmul.f32 %v3162_v0, %v2955_v20 }
 0xa68   :  { %v1888_v50 = vpop.permute.xlu0 %1887 }
 0xa69   :  { %v1902_v31 = vsel %vm262_vm5, %v1900_v28, %v1888_v50 }
 0xa6a   :  { %v1886_v26 = vpop.permute.xlu1 %1885 }
 0xa6b   :  { %v1901_v39 = vsel %vm262_vm5, %v1899_v33, %v1886_v26 }
 0xa6d   :  { %v1896_v55 = vpop.permute.xlu0 %1895 }
 0xa6e   :  { %v1904_v32 = vsel %vm975_vm1, %v1902_v31, %v1896_v55 }
 0xa6f   :  { %v1910_v51 = vadd.f32 %v1908_v29, %v1904_v32  ;;  %v1894_v38 = vpop.permute.xlu1 %1893 }
 0xa70   :  { %v1903_v17 = vsel %vm975_vm1, %v1901_v39, %v1894_v38 }
 0xa71   :  { %v2128_v43 = vadd.f32 %v1910_v51, %v3142_v37  ;;  %v2139_v41 = vadd.f32 %v1910_v51, %v3152_v45  ;;  %v1909_v46 = vadd.f32 %v1908_v29, %v1903_v17  ;;  %2525 = vmatpush3.msra.mxu0 %v1910_v51  ;;  %v385_v37 = vadd.f32 %v383_v52, %v379_v24  ;;  %v61_v24 = vld [vmem:[%s3290_s4 + $0x80] sm:$0xff] }
 0xa72   :  { %2526 = vmatprep.subr.mxu0 %v2708_v44 }
 0xa73   :  { %v2127_v49 = vadd.f32 %v1909_v46, %v3138_v5  ;;  %v2138_v2 = vadd.f32 %v1909_v46, %v3146_v40  ;;  %2521 = vmatprep.mubr.msk.f32.mxu1 %vm986_vm2, %v1909_v46  ;;  %2527 = vmatpush3.msra.mxu0 %v1909_v46  ;;  %v2130_v20 = vsel %vm986_vm2, %v2128_v43, -inf  ;;  %v2141_v45 = vsel %vm986_vm2, %v2139_v41, -inf  ;;  %v63_v46 = vld [vmem:[%s3290_s4 + $0x90] sm:$0xff] }
 0xa74   :  { %2522 = vmatmul.mubr.msk.f32.vlgmr.msra.gmra.mxu1 %vm986_vm2, %v1910_v51  ;;  %2531 = vmatprep.subr.mxu0 %v2708_v44  ;;  %v388_v56 = vadd.f32 %v387_v48, %v385_v37 }
 0xa75   :  { %v2129_v53 = vsel %vm986_vm2, %v2127_v49, -inf  ;;  %v2140_v54 = vsel %vm986_vm2, %v2138_v2, -inf  ;;  %2543 = vmatpush3.msra.mxu1 %v56_v47  ;;  %2544 = vmatprep.mubr.msk.f32.mxu1 %vm2710_vm14, %v2708_v44 }
 0xa76   :  { %v2131_v5 = vmax.f32 %v2129_v53, %v2130_v20  ;;  %v2142_v40 = vmax.f32 %v2140_v54, %v2141_v45 }
 0xa78   :  { %v2132_v57 = vrot.slane %v2131_v5, 4  ;;  %v2143_v35 = vrot.slane %v2142_v40, 4  ;;  %2545 = vmatmul.mubr.msk.f32.vlgmr.msra.gmra.mxu1 %vm103_vm0, %v388_v56  ;;  %vm2307_vm0 = vcmask 1024  }
 0xa7a   :  { %v2133_v58 = vmax.f32 %v2131_v5, %v2132_v57  ;;  %v2144_v36 = vmax.f32 %v2142_v40, %v2143_v35  ;;  %v2305_v40 = vstv %s2319_s8 }
 0xa7c   :  { %v2134_v7 = vrot.slane %v2133_v58, 2  ;;  %v2145_v60 = vrot.slane %v2144_v36, 2 }
 0xa7e   :  { %v2135_v61 = vmax.f32 %v2133_v58, %v2134_v7  ;;  %v2146_v63 = vmax.f32 %v2144_v36, %v2145_v60 }
 0xa80   :  { %v2136_v4 = vrot.slane %v2135_v61, 1  ;;  %v2147_v6 = vrot.slane %v2146_v63, 1 }
 0xa82   :  { %v2137_v10 = vmax.f32 %v2135_v61, %v2136_v4  ;;  %v2148_v18 = vmax.f32 %v2146_v63, %v2147_v6 }
 0xa84   :  { %v2149_v21 = vsel %vm376_vm13, %v2137_v10, %v2148_v18 }
 0xa85   :  { %v2156_v45 = vmul.f32 %v2149_v21, %v3164_v8 }
 0xb34   :  { %v2523_v12 = vpop.f32.mrf.mxu1 }
 0xb35   :  { %v1990_v3 = vadd.f32 %v2523_v12, %v1911_v11 }
 0xb36   :  { %v1984_v15 = vpop.f32.mrf.mxu1 }
 0xb37   :  { %v1994_v59 = vsub.f32 0.0, %v1990_v3  ;;  %v1985_v13 = vadd.f32 %v1984_v15, %v1911_v11 }
 0xb38   :  { %v2300_v16 = vpop.f32.mrf.mxu1 }
 0xb39   :  { %v1997_v19 = vmul.f32 1.442695, %v1994_v59  ;;  %v1993_v50 = vsub.f32 0.0, %v1985_v13  ;;  %v2301_v54 = vadd.f32 %v2300_v16, %v3184_v9 }
 0xb3a   :  { %v2546_v22 = vpop.f32.mrf.mxu1 }
 0xb3b   :  { %v1995_v25 = vmul.f32 1.442695, %v1993_v50  ;;  %2670 = vpow2.f32 %v1997_v19 }
 0xb3d   :  { %2672 = vpow2.f32 %v1995_v25 }
 0xb48   :  { %v2671_v26 = vpop.eup %2670 }
 0xb49   :  { %v2000_v30 = vadd.f32 1.0, %v2671_v26 }
 0xb4a   :  { %v2673_v27 = vpop.eup %2672 }
 0xb4b   :  { %v1999_v29 = vadd.f32 1.0, %v2673_v27 }
 0xb4d   :  { %2674 = vrcp.f32 %v1999_v29 }
 0xb4e   :  { %2676 = vrcp.f32 %v2000_v30 }
 0xb5a   :  { %v2675_v28 = vpop.eup %2674 }
 0xb5b   :  { %2005 = vxpose.xlu1.b32.start [1/2] (short) (narrow) %v2675_v28, 8  ;;  %v2677_v14 = vpop.eup %2676 }
 0xb5f   :  { %2006 = vxpose.xlu1.b32.end [2/2] (short) (narrow) %v2677_v14, 8 }
 0xbd7   :  { %v2021_v31 = vpop.trf.xlu1 }
 0xbd8   :  { %v2040_v55 = vrot.slane %v2021_v31, %v2800_v34 }
 0xbda   :  { %v2041_v33 = vadd.f32 %v2040_v55, %v2853_v23  ;;  %v64_v23 = vld [vmem:[%s3290_s4 + $0x98] sm:$0xff] }
 0xbdc   :  { %v2042_v32 = vsel %vm245_vm11, %v2041_v33, -inf }
 0xbdd   :  { %2043 = vmax.xlane.f32.xlu0 %v2042_v32 }
 0xc66   :  { %v2044_v39 = vpop.xlane.xlu0 %2043 }
 0xc67   :  { %v2045_v51 = vsub.f32 %v2041_v33, %v2044_v39 }
 0xc69   :  { %v2046_v38 = vmul.f32 1.442695, %v2045_v51 }
 0xc6b   :  { %2678 = vpow2.f32 %v2046_v38 }
 0xc78   :  { %v2679_v42 = vpop.eup %2678 }
 0xc79   :  { %v2048_v52 = vsel %vm245_vm11, %v2679_v42, 0.0 }
 0xc7a   :  { %2049 = vadd.xlane.f32.xlu0 %v2048_v52 }
 0xd03   :  { %v2050_v17 = vpop.xlane.xlu0 %2049 }
 0xd04   :  { %2680 = vrcp.f32 %v2050_v17 }
 0xd11   :  { %v2681_v43 = vpop.eup %2680 }
 0xd12   :  { %v2052_v41 = vmul.f32 %v2681_v43, %v2679_v42 }
 0xd14   :  { %v2053_v34 = vsel %vm260_vm15, %v2052_v41, %v2931_v62  ;;  %v62_v62 = vld [vmem:[%s3290_s4 + $0x88] sm:$0xff] }
 0xd15   :  { %2529 = vmatmul.mubr.msk.f32.vlgmr.msra.gmra.mxu0 %vm262_vm5, %v2053_v34 }
 0xd16   :  { %2539 = vmatprep.mubr.msk.f32.mxu0 %vm2710_vm14, %v2708_v44  ;;  %2532 = vmatpush3.msra.mxu0 %v64_v23 }
 0xd17   :  { %2533 = vmatprep.subr.mxu0 %v2708_v44 }
 0xd18   :  { %2534 = vmatpush3.msra.mxu0 %v63_v46 }
 0xd19   :  { %2535 = vmatprep.subr.mxu0 %v2708_v44 }
 0xd1a   :  { %2536 = vmatpush3.msra.mxu0 %v62_v62 }
 0xd1b   :  { %2537 = vmatprep.subr.mxu0 %v2708_v44 }
 0xd1c   :  { %2538 = vmatpush3.msra.mxu0 %v61_v24 }
 0xdd5   :  { %v2123_v47 = vpop.f32.mrf.mxu0 }
 0xdd6   :  { %v2151_v48 = vmul.f32 %v2123_v47, %v3158_v1  ;;  %v2150_v2 = vmul.f32 %v2123_v47, %v3162_v0 }
 0xdd7   :  { %v2530_v49 = vpop.f32.mrf.mxu0 }
 0xdd8   :  { %v2153_v37 = vrot.slane %v2151_v48, 2 }
 0xdda   :  { %v2155_v20 = vadd.f32 %v2153_v37, %v2150_v2 }
 0xddc   :  { %v2157_v53 = vadd.f32 %v2156_v45, %v2155_v20 }
 0xdde   :  { %2540 = vmatmul.mubr.msk.f32.vlgmr.msra.gmra.mxu0 %vm986_vm2, %v2157_v53 }
 0xe9e   :  { %v2227_v5 = vpop.f32.mrf.mxu0 }
 0xe9f   :  { %v2304_v44 = vadd.f32 %v2301_v54, %v2227_v5 }
 0xea0   :  { %v2541_v56 = vpop.f32.mrf.mxu0 }
 0xea1   :  { %v2306_v57 = vadd.f32 %v2305_v40, %v2304_v44 }
 0xea3   :  { %2308 = vst.msk [vmem:[%s3291_s5] sm:$0x3] %vm2307_vm0, %v2306_v57 }
 0xea4   :  { %2313 = vsyncpa [#allocation3], 1 }

</bundles_post_ra>
